<compile_context>
chip_gen: v7x
topology: tpu7x:2x2x1
jax: 0.10.0
libtpu: 0.0.40
codegen_flags: <defaults>
</compile_context>

<pallas_src>
import jax
import jax.numpy as jnp
from jax.experimental import pallas as pl
from jax.experimental.pallas import tpu as pltpu


def highway_kernel(x_ref, w0_ref, b0_ref, w1_ref, b1_ref, o_ref):
    """Two fused highway layers on one (packed) batch tile.

    For each layer i (weights pre-fused as W_i = [Wh_i | Wg_i], block-diagonal
    when rows are lane-packed, output halves padded to 128-lane boundaries):
        hg = x @ W_i + b_i          # one (TILE_B, 2*Dh) matmul
        h  = relu(hg[:, :Dp])
        g  = sigmoid(hg[:, Dh:Dh+Dp])
        x  = x + g * (h - x)        # == g*h + (1-g)*x, 3 VPU ops
    """
    Dp = x_ref.shape[-1]            # packed feature width (lane axis of x/out)
    Dh = w0_ref.shape[-1] // 2      # 128-aligned half-width of the fused output
    x = x_ref[...]

    def layer(x, w_ref, b_ref):
        hg = jnp.dot(x, w_ref[...], preferred_element_type=jnp.float32)
        hg = hg + b_ref[...]
        h = jnp.maximum(hg[:, :Dp], 0.0)          # ReLU    (VPU)
        g = jax.nn.sigmoid(hg[:, Dh:Dh + Dp])     # Sigmoid (EUP slot)
        return x + g * (h - x)

    x = layer(x, w0_ref, b0_ref)
    x = layer(x, w1_ref, b1_ref)
    o_ref[...] = x.astype(o_ref.dtype)


def _round_up(n, m):
    return ((n + m - 1) // m) * m


def _pack_factor(D):
    """Rows packed per lane slab: target 256 lanes on v6e/v7x, 128 on v4/v5."""
    target = 128
    try:
        kind = jax.devices()[0].device_kind.lower()
        if not any(t in kind for t in ("v2", "v3", "v4", "v5")):
            target = 256            # 256-deep MXU generations (v6e / v7x)
    except Exception:
        pass
    if D >= target or target % D != 0:
        return 1                    # no clean packing; fall back to P=1
    return target // D


def _prep_layer(params, name_lin, name_gate, P, Dh):
    """Fuse [Wh | Wg] for one layer, lane-packed block-diagonally (P rows/slab).

    PyTorch nn.Linear stores W as (out, in); we pre-transpose to (in, out) so
    the kernel computes x @ W + b directly on the MXU.
    """
    wl, bl = params[name_lin]
    wg, bg = params[name_gate]
    wh_t, wg_t = wl.T, wg.T                       # (D, D) "in x out"
    bh, bgv = bl, bg
    if P > 1:
        eye = jnp.eye(P, dtype=wh_t.dtype)
        wh_t = jnp.kron(eye, wh_t)                # (P*D, P*D) block-diagonal
        wg_t = jnp.kron(eye, wg_t)
        bh = jnp.tile(bh, P)
        bgv = jnp.tile(bgv, P)
    Dp = wh_t.shape[1]
    if Dh > Dp:                                   # align each half to 128 lanes
        wh_t = jnp.pad(wh_t, ((0, 0), (0, Dh - Dp)))
        wg_t = jnp.pad(wg_t, ((0, 0), (0, Dh - Dp)))
        bh = jnp.pad(bh, (0, Dh - Dp))
        bgv = jnp.pad(bgv, (0, Dh - Dp))
    w = jnp.concatenate([wh_t, wg_t], axis=1)     # (P*D, 2*Dh)
    b = jnp.concatenate([bh, bgv]).reshape(1, -1)  # (1, 2*Dh)
    return w, b


def highway_forward(x, params, *, tile_b=1024):
    """x: (B, 2*d) float32.
    params: dict name -> (W, b) in PyTorch nn.Linear layout W:(out,in), b:(out,)."""
    B, D = x.shape

    P = _pack_factor(D)                 # rows packed into one lane slab
    Dp = P * D                          # packed feature width
    Dh = _round_up(Dp, 128)             # 128-aligned half-width of fused output

    w0, b0 = _prep_layer(params, "linear0", "gate0", P, Dh)
    w1, b1 = _prep_layer(params, "linear1", "gate1", P, Dh)

    # Lane-pack P consecutive rows into one slab. The reshape is a free
    # contiguous view; only pad (<= P-1 rows) when B isn't a multiple of P.
    Bp = _round_up(B, P)
    xw = x if Bp == B else jnp.pad(x, ((0, Bp - B), (0, 0)))
    xp = xw.reshape(Bp // P, Dp)
    Bpk = Bp // P                       # packed row count

    # Batch tile (packed rows): multiple of 8 sublanes, sized to a ~12 MiB
    # VMEM budget (fits v5e's 16 MiB scoped default and v7x's 64 MiB), and
    # capped at ceil(rows/2) so there are >=2 grid steps for v7x megacore.
    bytes_per_row = 8 * Dp * x.dtype.itemsize   # x/out double-buffered + temporaries
    budget_rows = max(8, (12 << 20) // max(1, bytes_per_row))
    if Bpk <= 16:
        tb = Bpk                                 # single full-extent block
    else:
        tb = min(tile_b, budget_rows, _round_up(pl.cdiv(Bpk, 2), 8))
        tb = max(8, (tb // 8) * 8)
    grid = (pl.cdiv(Bpk, tb),)                   # Pallas masks the ragged tail

    resident = lambda i: (0, 0)                  # weights stay in VMEM across grid

    def build(single_buffer_weights):
        w_kw = {}
        if single_buffer_weights:
            # Constant index_map -> no need to double-buffer the weights.
            w_kw = dict(pipeline_mode=pl.Buffered(1))
        return pl.pallas_call(
            highway_kernel,
            out_shape=jax.ShapeDtypeStruct((Bpk, Dp), x.dtype),
            grid_spec=pltpu.PrefetchScalarGridSpec(
                num_scalar_prefetch=0,
                grid=grid,
                in_specs=[
                    pl.BlockSpec((tb, Dp), lambda i: (i, 0)),        # x tile
                    pl.BlockSpec((Dp, 2 * Dh), resident, **w_kw),    # W0=[Wh0|Wg0]
                    pl.BlockSpec((1, 2 * Dh), resident, **w_kw),     # b0
                    pl.BlockSpec((Dp, 2 * Dh), resident, **w_kw),    # W1=[Wh1|Wg1]
                    pl.BlockSpec((1, 2 * Dh), resident, **w_kw),     # b1
                ],
                out_specs=pl.BlockSpec((tb, Dp), lambda i: (i, 0)),
            ),
            compiler_params=pltpu.CompilerParams(
                dimension_semantics=("parallel",),
            ),
        )

    try:
        outp = build(True)(xp, w0, b0, w1, b1)
    except Exception:
        # Fallback: default double-buffering of the (tiny) resident weights.
        outp = build(False)(xp, w0, b0, w1, b1)

    out = outp.reshape(Bp, D)           # unpack lane slabs back to rows (free)
    return out if Bp == B else out[:B]


def highway_reference(x, params):
    """Pure-JAX reference matching the PyTorch forward."""
    y = x
    for name_lin, name_gate in (("linear0", "gate0"), ("linear1", "gate1")):
        wl, bl = params[name_lin]
        wg, bg = params[name_gate]
        h = jax.nn.relu(y @ wl.T + bl)
        g = jax.nn.sigmoid(y @ wg.T + bg)
        y = g * h + (1.0 - g) * y
    return y


def init_params(key, d):
    """Deterministic init with nn.Linear shapes: W (2d, 2d), b (2d,)."""
    D = 2 * d
    params = {}
    names = ["linear0", "gate0", "linear1", "gate1"]
    keys = jax.random.split(key, 2 * len(names))
    bound = 1.0 / jnp.sqrt(D)
    for i, name in enumerate(names):
        w = jax.random.uniform(keys[2 * i], (D, D), jnp.float32, -bound, bound)
        b = jax.random.uniform(keys[2 * i + 1], (D,), jnp.float32, -bound, bound)
        params[name] = (w, b)
    return params


if __name__ == "__main__":
    d = 16          # HighWay(d) -> feature size 2*d = 32
    B = 8           # small batch of row vectors
    key = jax.random.PRNGKey(0)
    kx, kp = jax.random.split(key)

    x = jax.random.normal(kx, (B, 2 * d), jnp.float32)
    params = init_params(kp, d)

    out = highway_forward(x, params)
    out = jax.block_until_ready(out)

    ref = highway_reference(x, params)
    assert out.shape == (B, 2 * d)
    assert jnp.allclose(out, ref, atol=1e-5, rtol=1e-5), "mismatch vs reference"

    print("KERNEL_OK")
</pallas_src>

<mosaic_0001>
module attributes {stable_mosaic.version = 11 : i64} {
  func.func @highway_kernel(%arg0: i32, %arg1: memref<1x256xf32, #tpu.memory_space<vmem>>, %arg2: memref<256x512xf32, #tpu.memory_space<vmem>>, %arg3: memref<1x512xf32, #tpu.memory_space<vmem>>, %arg4: memref<256x512xf32, #tpu.memory_space<vmem>>, %arg5: memref<1x512xf32, #tpu.memory_space<vmem>>, %arg6: memref<1x256xf32, #tpu.memory_space<vmem>>) attributes {dimension_semantics = [#tpu.dimension_semantics<parallel>], iteration_bounds = array<i64: 1>, scalar_prefetch = 0 : i64, scratch_operands = 0 : i64, tpu.core_type = #tpu.core_type<tc>, window_params = [{transform_indices = @transform_0, window_bounds = array<i64: 1, 256>}, {pipeline_mode = #tpu.pipeline_mode<synchronous>, transform_indices = @transform_1, window_bounds = array<i64: 256, 512>}, {pipeline_mode = #tpu.pipeline_mode<synchronous>, transform_indices = @transform_2, window_bounds = array<i64: 1, 512>}, {pipeline_mode = #tpu.pipeline_mode<synchronous>, transform_indices = @transform_3, window_bounds = array<i64: 256, 512>}, {pipeline_mode = #tpu.pipeline_mode<synchronous>, transform_indices = @transform_4, window_bounds = array<i64: 1, 512>}, {transform_indices = @transform_5, window_bounds = array<i64: 1, 256>}]} {
    %c0 = arith.constant 0 : index
    %c0_0 = arith.constant 0 : index
    %0 = vector.load %arg1[%c0, %c0_0] : memref<1x256xf32, #tpu.memory_space<vmem>>, vector<1x256xf32>
    %c0_1 = arith.constant 0 : index
    %c0_2 = arith.constant 0 : index
    %1 = vector.load %arg2[%c0_1, %c0_2] : memref<256x512xf32, #tpu.memory_space<vmem>>, vector<256x512xf32>
    %cst = arith.constant dense<0.000000e+00> : vector<1x512xf32>
    %2 = tpu.matmul %0, %1, %cst {dimension_numbers = #tpu.dot_dimension_numbers<[1], [0], [0], [1], [0, 0, 1, 1], [], []>} : vector<1x256xf32>, vector<256x512xf32>, vector<1x512xf32> -> vector<1x512xf32>
    %c0_3 = arith.constant 0 : index
    %c0_4 = arith.constant 0 : index
    %3 = vector.load %arg3[%c0_3, %c0_4] : memref<1x512xf32, #tpu.memory_space<vmem>>, vector<1x512xf32>
    %4 = arith.addf %2, %3 : vector<1x512xf32>
    %5 = vector.extract_strided_slice %4 {offsets = [0, 0], sizes = [1, 256], strides = [1, 1]} : vector<1x512xf32> to vector<1x256xf32>
    %cst_5 = arith.constant 0.000000e+00 : f32
    %6 = vector.broadcast %cst_5 : f32 to vector<1x256xf32>
    %7 = arith.maximumf %5, %6 : vector<1x256xf32>
    %8 = vector.extract_strided_slice %4 {offsets = [0, 256], sizes = [1, 256], strides = [1, 1]} : vector<1x512xf32> to vector<1x256xf32>
    %9 = arith.negf %8 : vector<1x256xf32>
    %10 = math.exp %9 : vector<1x256xf32>
    %cst_6 = arith.constant 1.000000e+00 : f32
    %11 = vector.broadcast %cst_6 : f32 to vector<1x256xf32>
    %12 = arith.addf %11, %10 : vector<1x256xf32>
    %13 = arith.divf %11, %12 : vector<1x256xf32>
    %14 = arith.subf %7, %0 : vector<1x256xf32>
    %15 = arith.mulf %13, %14 : vector<1x256xf32>
    %16 = arith.addf %0, %15 : vector<1x256xf32>
    %c0_7 = arith.constant 0 : index
    %c0_8 = arith.constant 0 : index
    %17 = vector.load %arg4[%c0_7, %c0_8] : memref<256x512xf32, #tpu.memory_space<vmem>>, vector<256x512xf32>
    %cst_9 = arith.constant dense<0.000000e+00> : vector<1x512xf32>
    %18 = tpu.matmul %16, %17, %cst_9 {dimension_numbers = #tpu.dot_dimension_numbers<[1], [0], [0], [1], [0, 0, 1, 1], [], []>} : vector<1x256xf32>, vector<256x512xf32>, vector<1x512xf32> -> vector<1x512xf32>
    %c0_10 = arith.constant 0 : index
    %c0_11 = arith.constant 0 : index
    %19 = vector.load %arg5[%c0_10, %c0_11] : memref<1x512xf32, #tpu.memory_space<vmem>>, vector<1x512xf32>
    %20 = arith.addf %18, %19 : vector<1x512xf32>
    %21 = vector.extract_strided_slice %20 {offsets = [0, 0], sizes = [1, 256], strides = [1, 1]} : vector<1x512xf32> to vector<1x256xf32>
    %cst_12 = arith.constant 0.000000e+00 : f32
    %22 = vector.broadcast %cst_12 : f32 to vector<1x256xf32>
    %23 = arith.maximumf %21, %22 : vector<1x256xf32>
    %24 = vector.extract_strided_slice %20 {offsets = [0, 256], sizes = [1, 256], strides = [1, 1]} : vector<1x512xf32> to vector<1x256xf32>
    %25 = arith.negf %24 : vector<1x256xf32>
    %26 = math.exp %25 : vector<1x256xf32>
    %cst_13 = arith.constant 1.000000e+00 : f32
    %27 = vector.broadcast %cst_13 : f32 to vector<1x256xf32>
    %28 = arith.addf %27, %26 : vector<1x256xf32>
    %29 = arith.divf %27, %28 : vector<1x256xf32>
    %30 = arith.subf %23, %16 : vector<1x256xf32>
    %31 = arith.mulf %29, %30 : vector<1x256xf32>
    %32 = arith.addf %16, %31 : vector<1x256xf32>
    %c0_14 = arith.constant 0 : index
    %c0_15 = arith.constant 0 : index
    %33 = vector.load %arg6[%c0_14, %c0_15] : memref<1x256xf32, #tpu.memory_space<vmem>>, vector<1x256xf32>
    tpu.vector_store %arg6[%c0_14, %c0_15], %32 {strides = array<i32>} : memref<1x256xf32, #tpu.memory_space<vmem>>, vector<1x256xf32>,
    return
  }
  func.func @transform_0(%arg0: i32) -> (i32, i32) {
    %c0_i32 = arith.constant 0 : i32
    %c0_i32_0 = arith.constant 0 : i32
    return %arg0, %c0_i32 : i32, i32
  }
  func.func @transform_1(%arg0: i32) -> (i32, i32) {
    %c0_i32 = arith.constant 0 : i32
    %c0_i32_0 = arith.constant 0 : i32
    %c0_i32_1 = arith.constant 0 : i32
    return %c0_i32, %c0_i32_0 : i32, i32
  }
  func.func @transform_2(%arg0: i32) -> (i32, i32) {
    %c0_i32 = arith.constant 0 : i32
    %c0_i32_0 = arith.constant 0 : i32
    %c0_i32_1 = arith.constant 0 : i32
    return %c0_i32, %c0_i32_0 : i32, i32
  }
  func.func @transform_3(%arg0: i32) -> (i32, i32) {
    %c0_i32 = arith.constant 0 : i32
    %c0_i32_0 = arith.constant 0 : i32
    %c0_i32_1 = arith.constant 0 : i32
    return %c0_i32, %c0_i32_0 : i32, i32
  }
  func.func @transform_4(%arg0: i32) -> (i32, i32) {
    %c0_i32 = arith.constant 0 : i32
    %c0_i32_0 = arith.constant 0 : i32
    %c0_i32_1 = arith.constant 0 : i32
    return %c0_i32, %c0_i32_0 : i32, i32
  }
  func.func @transform_5(%arg0: i32) -> (i32, i32) {
    %c0_i32 = arith.constant 0 : i32
    %c0_i32_0 = arith.constant 0 : i32
    return %arg0, %c0_i32 : i32, i32
  }
}

module attributes {stable_mosaic.version = 11 : i64} {
  func.func @highway_kernel(%arg0: i32, %arg1: memref<1x256xf32, #tpu.memory_space<vmem>>, %arg2: memref<256x512xf32, #tpu.memory_space<vmem>>, %arg3: memref<1x512xf32, #tpu.memory_space<vmem>>, %arg4: memref<256x512xf32, #tpu.memory_space<vmem>>, %arg5: memref<1x512xf32, #tpu.memory_space<vmem>>, %arg6: memref<1x256xf32, #tpu.memory_space<vmem>>) attributes {dimension_semantics = [#tpu.dimension_semantics<parallel>], iteration_bounds = array<i64: 1>, scalar_prefetch = 0 : i64, scratch_operands = 0 : i64, tpu.core_type = #tpu.core_type<tc>, window_params = [{transform_indices = @transform_0, window_bounds = array<i64: 1, 256>}, {pipeline_mode = #tpu.pipeline_mode<synchronous>, transform_indices = @transform_1, window_bounds = array<i64: 256, 512>}, {pipeline_mode = #tpu.pipeline_mode<synchronous>, transform_indices = @transform_2, window_bounds = array<i64: 1, 512>}, {pipeline_mode = #tpu.pipeline_mode<synchronous>, transform_indices = @transform_3, window_bounds = array<i64: 256, 512>}, {pipeline_mode = #tpu.pipeline_mode<synchronous>, transform_indices = @transform_4, window_bounds = array<i64: 1, 512>}, {transform_indices = @transform_5, window_bounds = array<i64: 1, 256>}]} {
    %c0 = arith.constant 0 : index
    %c0_0 = arith.constant 0 : index
    %0 = vector.load %arg1[%c0, %c0_0] : memref<1x256xf32, #tpu.memory_space<vmem>>, vector<1x256xf32>
    %c0_1 = arith.constant 0 : index
    %c0_2 = arith.constant 0 : index
    %1 = vector.load %arg2[%c0_1, %c0_2] : memref<256x512xf32, #tpu.memory_space<vmem>>, vector<256x512xf32>
    %cst = arith.constant dense<0.000000e+00> : vector<1x512xf32>
    %2 = tpu.matmul %0, %1, %cst {dimension_numbers = #tpu.dot_dimension_numbers<[1], [0], [0], [1], [0, 0, 1, 1], [], []>} : vector<1x256xf32>, vector<256x512xf32>, vector<1x512xf32> -> vector<1x512xf32>
    %c0_3 = arith.constant 0 : index
    %c0_4 = arith.constant 0 : index
    %3 = vector.load %arg3[%c0_3, %c0_4] : memref<1x512xf32, #tpu.memory_space<vmem>>, vector<1x512xf32>
    %4 = arith.addf %2, %3 : vector<1x512xf32>
    %5 = vector.extract_strided_slice %4 {offsets = [0, 0], sizes = [1, 256], strides = [1, 1]} : vector<1x512xf32> to vector<1x256xf32>
    %cst_5 = arith.constant 0.000000e+00 : f32
    %6 = vector.broadcast %cst_5 : f32 to vector<1x256xf32>
    %7 = arith.maximumf %5, %6 : vector<1x256xf32>
    %8 = vector.extract_strided_slice %4 {offsets = [0, 256], sizes = [1, 256], strides = [1, 1]} : vector<1x512xf32> to vector<1x256xf32>
    %9 = arith.negf %8 : vector<1x256xf32>
    %10 = math.exp %9 : vector<1x256xf32>
    %cst_6 = arith.constant 1.000000e+00 : f32
    %11 = vector.broadcast %cst_6 : f32 to vector<1x256xf32>
    %12 = arith.addf %11, %10 : vector<1x256xf32>
    %13 = arith.divf %11, %12 : vector<1x256xf32>
    %14 = arith.subf %7, %0 : vector<1x256xf32>
    %15 = arith.mulf %13, %14 : vector<1x256xf32>
    %16 = arith.addf %0, %15 : vector<1x256xf32>
    %c0_7 = arith.constant 0 : index
    %c0_8 = arith.constant 0 : index
    %17 = vector.load %arg4[%c0_7, %c0_8] : memref<256x512xf32, #tpu.memory_space<vmem>>, vector<256x512xf32>
    %cst_9 = arith.constant dense<0.000000e+00> : vector<1x512xf32>
    %18 = tpu.matmul %16, %17, %cst_9 {dimension_numbers = #tpu.dot_dimension_numbers<[1], [0], [0], [1], [0, 0, 1, 1], [], []>} : vector<1x256xf32>, vector<256x512xf32>, vector<1x512xf32> -> vector<1x512xf32>
    %c0_10 = arith.constant 0 : index
    %c0_11 = arith.constant 0 : index
    %19 = vector.load %arg5[%c0_10, %c0_11] : memref<1x512xf32, #tpu.memory_space<vmem>>, vector<1x512xf32>
    %20 = arith.addf %18, %19 : vector<1x512xf32>
    %21 = vector.extract_strided_slice %20 {offsets = [0, 0], sizes = [1, 256], strides = [1, 1]} : vector<1x512xf32> to vector<1x256xf32>
    %cst_12 = arith.constant 0.000000e+00 : f32
    %22 = vector.broadcast %cst_12 : f32 to vector<1x256xf32>
    %23 = arith.maximumf %21, %22 : vector<1x256xf32>
    %24 = vector.extract_strided_slice %20 {offsets = [0, 256], sizes = [1, 256], strides = [1, 1]} : vector<1x512xf32> to vector<1x256xf32>
    %25 = arith.negf %24 : vector<1x256xf32>
    %26 = math.exp %25 : vector<1x256xf32>
    %cst_13 = arith.constant 1.000000e+00 : f32
    %27 = vector.broadcast %cst_13 : f32 to vector<1x256xf32>
    %28 = arith.addf %27, %26 : vector<1x256xf32>
    %29 = arith.divf %27, %28 : vector<1x256xf32>
    %30 = arith.subf %23, %16 : vector<1x256xf32>
    %31 = arith.mulf %29, %30 : vector<1x256xf32>
    %32 = arith.addf %16, %31 : vector<1x256xf32>
    %c0_14 = arith.constant 0 : index
    %c0_15 = arith.constant 0 : index
    %33 = vector.load %arg6[%c0_14, %c0_15] : memref<1x256xf32, #tpu.memory_space<vmem>>, vector<1x256xf32>
    tpu.vector_store %arg6[%c0_14, %c0_15], %32 {strides = array<i32>} : memref<1x256xf32, #tpu.memory_space<vmem>>, vector<1x256xf32>,
    return
  }
  func.func @transform_0(%arg0: i32) -> (i32, i32) {
    %c0_i32 = arith.constant 0 : i32
    %c0_i32_0 = arith.constant 0 : i32
    return %arg0, %c0_i32 : i32, i32
  }
  func.func @transform_1(%arg0: i32) -> (i32, i32) {
    %c0_i32 = arith.constant 0 : i32
    %c0_i32_0 = arith.constant 0 : i32
    %c0_i32_1 = arith.constant 0 : i32
    return %c0_i32, %c0_i32_0 : i32, i32
  }
  func.func @transform_2(%arg0: i32) -> (i32, i32) {
    %c0_i32 = arith.constant 0 : i32
    %c0_i32_0 = arith.constant 0 : i32
    %c0_i32_1 = arith.constant 0 : i32
    return %c0_i32, %c0_i32_0 : i32, i32
  }
  func.func @transform_3(%arg0: i32) -> (i32, i32) {
    %c0_i32 = arith.constant 0 : i32
    %c0_i32_0 = arith.constant 0 : i32
    %c0_i32_1 = arith.constant 0 : i32
    return %c0_i32, %c0_i32_0 : i32, i32
  }
  func.func @transform_4(%arg0: i32) -> (i32, i32) {
    %c0_i32 = arith.constant 0 : i32
    %c0_i32_0 = arith.constant 0 : i32
    %c0_i32_1 = arith.constant 0 : i32
    return %c0_i32, %c0_i32_0 : i32, i32
  }
  func.func @transform_5(%arg0: i32) -> (i32, i32) {
    %c0_i32 = arith.constant 0 : i32
    %c0_i32_0 = arith.constant 0 : i32
    return %arg0, %c0_i32 : i32, i32
  }
}

</mosaic_0001>

<bundles_post_ra>
// kernel: tpu_custom_call.1
= control target key start
LH: loop header
LB: loop body
LE: loop exit
PB: predicated region body
PF: predicated region fallthrough
CT: control target
= control target key end

     0   :  { %10 = vsyncpa [#allocation3], 0  ;;  %s1272_s0 = inlined_call_operand.hbm [shape: f32[1,256], index: 0, kind: input, shape index: {}]   ;;  %s1273_s1 = inlined_call_operand.hbm [shape: f32[256,512], index: 1, kind: input, shape index: {}]   ;;  %s1274_s2 = inlined_call_operand.vmem [shape: f32[1,512], index: 2, kind: input, shape index: {}]   ;;  %s1275_s3 = inlined_call_operand.hbm [shape: f32[256,512], index: 3, kind: input, shape index: {}]   ;;  %s1276_s4 = inlined_call_operand.vmem [shape: f32[1,512], index: 4, kind: input, shape index: {}]   ;;  %s1277_s5 = inlined_call_operand.hbm [shape: f32[1,256], index: 5, kind: output, shape index: {}]  }
   0x1   :  { %11 = vsyncpa [#allocation6], 0 }
   0x2   :  { %12 = vsyncpa [#allocation4], 0  ;;  %s1139_s18 = smov [#allocation5]   ;;  %s1045_s22 = scalar_lea.hbm %s1273_s1, 16384 }
   0x3   :  { %s28_s19 = sshll.u32 %s1139_s18, 4  ;;  %p1046_p0 = scmp.ne.s32.totalorder %s1273_s1, %s1045_s22  ;;  %s29_s19 = int_to_ptr.vmem [resolvable:$true] %s28_s19 }
   0x4   :  { %p1049_p1 = scmp.lt.u32.totalorder %s1045_s22, %s1273_s1 }
   0x6   :  { %p1051_p2 = pnand %p1049_p1, %p1046_p0 }
   0x8   :  { %1054 = shalt.err (!%p1051_p2)
}
   0x9   :  { %s1055_s27 = scalar_lea.vmem %s29_s19, 16384  ;;  %p1060_p4 = scmp.lt.s32.totalorder %s29_s19, %s29_s19 }
   0xa   :  { %p1056_p3 = scmp.ne.s32.totalorder %s29_s19, %s1055_s27  ;;  %p1061_p5 = scmp.lt.s32.totalorder %s1055_s27, %s1055_s27 }
   0xc   :  { %p1062_p6 = por %p1061_p5, %p1060_p4 }
   0xe   :  { %p1063_p7 = pnand %p1062_p6, %p1056_p3 }
  0x10   :  { %1066 = shalt.err (!%p1063_p7)
}
  0x11   :  { %s1140_s28 = smov 512   ;;  %s1141_s29 = smov 32  }
  0x12   :  { %34 = dma.hbm_to_vmem [thread:$0]  %s1273_s1, 16384, %s29_s19, [#allocation6], %s1140_s28, %s1140_s28, %s1141_s29  }
  0x13   :  { %s1142_s7 = smov [#allocation2]   ;;  %s1143_s9 = smov [#allocation7]  }
  0x14   :  { %s19_s8 = sshll.u32 %s1142_s7, 4  ;;  %s42_s10 = sshll.u32 %s1143_s9, 4  ;;  %s20_s8 = int_to_ptr.vmem [resolvable:$true] %s19_s8  ;;  %s43_s10 = int_to_ptr.vmem [resolvable:$true] %s42_s10 }
  0x15   :  { %s1067_s13 = scalar_lea.hbm %s1272_s0, 32 }
  0x16   :  { %p1068_p8 = scmp.ne.s32.totalorder %s1272_s0, %s1067_s13  ;;  %p1071_p9 = scmp.lt.u32.totalorder %s1067_s13, %s1272_s0 }
  0x18   :  { %p1073_p10 = pnand %p1071_p9, %p1068_p8 }
  0x1a   :  { %1076 = shalt.err (!%p1073_p10)
}
  0x1b   :  { %s1077_s1 = scalar_lea.vmem %s20_s8, 32  ;;  %p1082_p12 = scmp.lt.s32.totalorder %s20_s8, %s20_s8 }
  0x1c   :  { %p1078_p11 = scmp.ne.s32.totalorder %s20_s8, %s1077_s1  ;;  %p1083_p13 = scmp.lt.s32.totalorder %s1077_s1, %s1077_s1 }
  0x1e   :  { %p1084_p0 = por %p1083_p13, %p1082_p12 }
  0x20   :  { %p1085_p1 = pnand %p1084_p0, %p1078_p11 }
  0x22   :  { %1088 = shalt.err (!%p1085_p1)
}
  0x23   :  { %22 = dma.hbm_to_vmem [thread:$0]  %s1272_s0, 32, %s20_s8, [#allocation3]  }
  0x24   :  { %s1089_s22 = scalar_lea.hbm %s1275_s3, 16384 }
  0x25   :  { %p1090_p2 = scmp.ne.s32.totalorder %s1275_s3, %s1089_s22  ;;  %p1093_p3 = scmp.lt.u32.totalorder %s1089_s22, %s1275_s3 }
  0x27   :  { %p1095_p4 = pnand %p1093_p3, %p1090_p2 }
  0x29   :  { %1098 = shalt.err (!%p1095_p4)
}
  0x2a   :  { %s1099_s27 = scalar_lea.vmem %s43_s10, 16384  ;;  %p1104_p6 = scmp.lt.s32.totalorder %s43_s10, %s43_s10 }
  0x2b   :  { %p1100_p5 = scmp.ne.s32.totalorder %s43_s10, %s1099_s27  ;;  %p1105_p7 = scmp.lt.s32.totalorder %s1099_s27, %s1099_s27 }
  0x2d   :  { %p1106_p8 = por %p1105_p7, %p1104_p6 }
  0x2f   :  { %p1107_p9 = pnand %p1106_p8, %p1100_p5 }
  0x31   :  { %1110 = shalt.err (!%p1107_p9)
}
  0x32   :  { %48 = dma.hbm_to_vmem [thread:$0]  %s1275_s3, 16384, %s43_s10, [#allocation6], %s1140_s28, %s1140_s28, %s1141_s29  }
  0x33   :  { %1133 = dma.done.wait [#allocation3], 32  }
  0x34   :  { %1134 = vsyncadd [#allocation3], 4294967264 }
  0x35   :  { %1135 = dma.done.wait [#allocation6], 32768  }
  0x36   :  { %1136 = vsyncadd [#allocation6], 4294934528  ;;  %v64_v0 = vld [vmem:[#allocation5 + $0x18] sm:$0xff]  ;;  %v63_v2 = vld [vmem:[#allocation5 + $0x10] sm:$0xff] }
  0x37   :  { %v68_v1 = vld [vmem:[#allocation5 + $0x38] sm:$0xff]  ;;  %v67_v4 = vld [vmem:[#allocation5 + $0x30] sm:$0xff]  ;;  %v62_v19 = vld [vmem:[#allocation5 + $0x8] sm:$0xff] }
  0x38   :  { %v830_v3 = vpack.c.bf16 %v68_v1, %v64_v0  ;;  %v72_v5 = vld [vmem:[#allocation5 + $0x58] sm:$0xff]  ;;  %v832_v7 = vpack.c.bf16 %v67_v4, %v63_v2  ;;  %v71_v9 = vld [vmem:[#allocation5 + $0x50] sm:$0xff]  ;;  %v66_v20 = vld [vmem:[#allocation5 + $0x28] sm:$0xff] }
  0x39   :  { %v76_v6 = vld [vmem:[#allocation5 + $0x78] sm:$0xff]  ;;  %v75_v10 = vld [vmem:[#allocation5 + $0x70] sm:$0xff]  ;;  %v766_v23 = vpack.c.bf16 %v66_v20, %v62_v19  ;;  %v61_v24 = vld [vmem:[#allocation5] sm:$0xff]  ;;  %v191_v19 = vlaneseq }
  0x3a   :  { %v834_v8 = vpack.c.bf16 %v76_v6, %v72_v5  ;;  %v80_v11 = vld [vmem:[#allocation5 + $0x98] sm:$0xff]  ;;  %831 = vmatprep.subr.bf16.mxu1 %v830_v3  ;;  %v836_v13 = vpack.c.bf16 %v75_v10, %v71_v9  ;;  %v79_v15 = vld [vmem:[#allocation5 + $0x90] sm:$0xff]  ;;  %v65_v28 = vld [vmem:[#allocation5 + $0x20] sm:$0xff] }
  0x3b   :  { %v84_v12 = vld [vmem:[#allocation5 + $0xb8] sm:$0xff]  ;;  %833 = vmatpush1.bf16.msra.mxu1 %v832_v7  ;;  %v83_v16 = vld [vmem:[#allocation5 + $0xb0] sm:$0xff]  ;;  %767 = vmatprep.subr.bf16.mxu0 %v766_v23  ;;  %v768_v30 = vpack.c.bf16 %v65_v28, %v61_v24  ;;  %v70_v31 = vld [vmem:[#allocation5 + $0x48] sm:$0xff]  ;;  %vm743_vm0 = vcmp.lt.s32.totalorder %v191_v19, 256 }
  0x3c   :  { %835 = vmatprep.subr.bf16.mxu1 %v834_v8  ;;  %v838_v14 = vpack.c.bf16 %v84_v12, %v80_v11  ;;  %v88_v17 = vld [vmem:[#allocation5 + $0xd8] sm:$0xff]  ;;  %v840_v21 = vpack.c.bf16 %v83_v16, %v79_v15  ;;  %v87_v22 = vld [vmem:[#allocation5 + $0xd0] sm:$0xff]  ;;  %v74_v32 = vld [vmem:[#allocation5 + $0x68] sm:$0xff] }
  0x3d   :  { %v92_v18 = vld [vmem:[#allocation5 + $0xf8] sm:$0xff]  ;;  %v91_v26 = vld [vmem:[#allocation5 + $0xf0] sm:$0xff]  ;;  %v770_v33 = vpack.c.bf16 %v74_v32, %v70_v31  ;;  %v69_v34 = vld [vmem:[#allocation5 + $0x40] sm:$0xff]  ;;  %769 = vmatpush1.bf16.msra.mxu0 %v768_v30  ;;  %v1219_v32 = vshrl.u32 %v191_v19, 7 }
  0x3e   :  { %v842_v25 = vpack.c.bf16 %v92_v18, %v88_v17  ;;  %v96_v27 = vld [vmem:[#allocation5 + $0x118] sm:$0xff]  ;;  %v73_v35 = vld [vmem:[#allocation5 + $0x60] sm:$0xff]  ;;  %v844_v36 = vpack.c.bf16 %v91_v26, %v87_v22  ;;  %v95_v37 = vld [vmem:[#allocation5 + $0x110] sm:$0xff] }
  0x3f   :  { %837 = vmatpush1.bf16.msra.mxu1 %v836_v13  ;;  %v100_v29 = vld [vmem:[#allocation5 + $0x138] sm:$0xff]  ;;  %v772_v38 = vpack.c.bf16 %v73_v35, %v69_v34  ;;  %v78_v39 = vld [vmem:[#allocation5 + $0x88] sm:$0xff]  ;;  %v99_v41 = vld [vmem:[#allocation5 + $0x130] sm:$0xff]  ;;  %771 = vmatprep.subr.bf16.mxu0 %v770_v33 }
  0x40   :  { %839 = vmatprep.subr.bf16.mxu1 %v838_v14  ;;  %v846_v40 = vpack.c.bf16 %v100_v29, %v96_v27  ;;  %v104_v42 = vld [vmem:[#allocation5 + $0x158] sm:$0xff]  ;;  %v82_v43 = vld [vmem:[#allocation5 + $0xa8] sm:$0xff]  ;;  %v77_v46 = vld [vmem:[#allocation5 + $0x80] sm:$0xff]  ;;  %v848_v50 = vpack.c.bf16 %v99_v41, %v95_v37 }
  0x41   :  { %v108_v44 = vld [vmem:[#allocation5 + $0x178] sm:$0xff]  ;;  %v774_v45 = vpack.c.bf16 %v82_v43, %v78_v39  ;;  %v81_v47 = vld [vmem:[#allocation5 + $0xa0] sm:$0xff]  ;;  %v86_v48 = vld [vmem:[#allocation5 + $0xc8] sm:$0xff]  ;;  %773 = vmatpush1.bf16.msra.mxu0 %v772_v38 }
  0x42   :  { %v90_v49 = vld [vmem:[#allocation5 + $0xe8] sm:$0xff]  ;;  %v103_v51 = vld [vmem:[#allocation5 + $0x150] sm:$0xff]  ;;  %v776_v53 = vpack.c.bf16 %v81_v47, %v77_v46  ;;  %v850_v54 = vpack.c.bf16 %v108_v44, %v104_v42  ;;  %v112_v55 = vld [vmem:[#allocation5 + $0x198] sm:$0xff] }
  0x43   :  { %841 = vmatpush1.bf16.msra.mxu1 %v840_v21  ;;  %v107_v52 = vld [vmem:[#allocation5 + $0x170] sm:$0xff]  ;;  %775 = vmatprep.subr.bf16.mxu0 %v774_v45  ;;  %v778_v56 = vpack.c.bf16 %v90_v49, %v86_v48  ;;  %v85_v57 = vld [vmem:[#allocation5 + $0xc0] sm:$0xff]  ;;  %v116_v59 = vld [vmem:[#allocation5 + $0x1b8] sm:$0xff]  ;;  %v1222_v45 = vsub.s32 1, %v1219_v32 }
  0x44   :  { %843 = vmatprep.subr.bf16.mxu1 %v842_v25  ;;  %v89_v58 = vld [vmem:[#allocation5 + $0xe0] sm:$0xff]  ;;  %v94_v60 = vld [vmem:[#allocation5 + $0x108] sm:$0xff]  ;;  %v852_v62 = vpack.c.bf16 %v107_v52, %v103_v51  ;;  %v111_v63 = vld [vmem:[#allocation5 + $0x190] sm:$0xff]  ;;  %v854_v2 = vpack.c.bf16 %v116_v59, %v112_v55 }
  0x45   :  { %v98_v61 = vld [vmem:[#allocation5 + $0x128] sm:$0xff]  ;;  %v115_v0 = vld [vmem:[#allocation5 + $0x1b0] sm:$0xff]  ;;  %777 = vmatpush1.bf16.msra.mxu0 %v776_v53  ;;  %v780_v1 = vpack.c.bf16 %v89_v58, %v85_v57  ;;  %v120_v3 = vld [vmem:[#allocation5 + $0x1d8] sm:$0xff] }
  0x46   :  { %779 = vmatprep.subr.bf16.mxu0 %v778_v56  ;;  %v782_v4 = vpack.c.bf16 %v98_v61, %v94_v60  ;;  %v93_v5 = vld [vmem:[#allocation5 + $0x100] sm:$0xff]  ;;  %v124_v7 = vld [vmem:[#allocation5 + $0x1f8] sm:$0xff]  ;;  %v102_v8 = vld [vmem:[#allocation5 + $0x148] sm:$0xff]  ;;  %v856_v10 = vpack.c.bf16 %v115_v0, %v111_v63 }
  0x47   :  { %845 = vmatpush1.bf16.msra.mxu1 %v844_v36  ;;  %v97_v6 = vld [vmem:[#allocation5 + $0x120] sm:$0xff]  ;;  %v106_v9 = vld [vmem:[#allocation5 + $0x168] sm:$0xff]  ;;  %v119_v11 = vld [vmem:[#allocation5 + $0x1d0] sm:$0xff]  ;;  %v858_v14 = vpack.c.bf16 %v124_v7, %v120_v3 }
  0x48   :  { %847 = vmatprep.subr.bf16.mxu1 %v846_v40  ;;  %v123_v12 = vld [vmem:[#allocation5 + $0x1f0] sm:$0xff]  ;;  %v784_v13 = vpack.c.bf16 %v97_v6, %v93_v5  ;;  %v128_v15 = vld [vmem:[#allocation5 + $0x218] sm:$0xff]  ;;  %v786_v16 = vpack.c.bf16 %v106_v9, %v102_v8  ;;  %v101_v17 = vld [vmem:[#allocation5 + $0x140] sm:$0xff] }
  0x49   :  { %781 = vmatpush1.bf16.msra.mxu0 %v780_v1  ;;  %v105_v18 = vld [vmem:[#allocation5 + $0x160] sm:$0xff]  ;;  %v132_v20 = vld [vmem:[#allocation5 + $0x238] sm:$0xff]  ;;  %v110_v21 = vld [vmem:[#allocation5 + $0x188] sm:$0xff]  ;;  %v860_v23 = vpack.c.bf16 %v123_v12, %v119_v11 }
  0x4a   :  { %783 = vmatprep.subr.bf16.mxu0 %v782_v4  ;;  %v114_v22 = vld [vmem:[#allocation5 + $0x1a8] sm:$0xff]  ;;  %v127_v24 = vld [vmem:[#allocation5 + $0x210] sm:$0xff]  ;;  %v788_v26 = vpack.c.bf16 %v105_v18, %v101_v17  ;;  %v862_v27 = vpack.c.bf16 %v132_v20, %v128_v15  ;;  %v136_v28 = vld [vmem:[#allocation5 + $0x258] sm:$0xff] }
  0x4b   :  { %849 = vmatpush1.bf16.msra.mxu1 %v848_v50  ;;  %v131_v25 = vld [vmem:[#allocation5 + $0x230] sm:$0xff]  ;;  %v790_v29 = vpack.c.bf16 %v114_v22, %v110_v21  ;;  %v109_v30 = vld [vmem:[#allocation5 + $0x180] sm:$0xff]  ;;  %v140_v33 = vld [vmem:[#allocation5 + $0x278] sm:$0xff] }
  0x4c   :  { %851 = vmatprep.subr.bf16.mxu1 %v850_v54  ;;  %v113_v31 = vld [vmem:[#allocation5 + $0x1a0] sm:$0xff]  ;;  %v118_v34 = vld [vmem:[#allocation5 + $0x1c8] sm:$0xff]  ;;  %v864_v36 = vpack.c.bf16 %v131_v25, %v127_v24  ;;  %v135_v37 = vld [vmem:[#allocation5 + $0x250] sm:$0xff]  ;;  %v866_v40 = vpack.c.bf16 %v140_v33, %v136_v28 }
  0x4d   :  { %785 = vmatpush1.bf16.msra.mxu0 %v784_v13  ;;  %v122_v35 = vld [vmem:[#allocation5 + $0x1e8] sm:$0xff]  ;;  %v139_v38 = vld [vmem:[#allocation5 + $0x270] sm:$0xff]  ;;  %v792_v39 = vpack.c.bf16 %v113_v31, %v109_v30  ;;  %v144_v41 = vld [vmem:[#allocation5 + $0x298] sm:$0xff] }
  0x4e   :  { %787 = vmatprep.subr.bf16.mxu0 %v786_v16  ;;  %v794_v42 = vpack.c.bf16 %v122_v35, %v118_v34  ;;  %v117_v43 = vld [vmem:[#allocation5 + $0x1c0] sm:$0xff]  ;;  %v148_v46 = vld [vmem:[#allocation5 + $0x2b8] sm:$0xff]  ;;  %v126_v47 = vld [vmem:[#allocation5 + $0x208] sm:$0xff]  ;;  %v868_v49 = vpack.c.bf16 %v139_v38, %v135_v37 }
  0x4f   :  { %853 = vmatpush1.bf16.msra.mxu1 %v852_v62  ;;  %v121_v44 = vld [vmem:[#allocation5 + $0x1e0] sm:$0xff]  ;;  %v130_v48 = vld [vmem:[#allocation5 + $0x228] sm:$0xff]  ;;  %v143_v50 = vld [vmem:[#allocation5 + $0x290] sm:$0xff]  ;;  %v870_v54 = vpack.c.bf16 %v148_v46, %v144_v41 }
  0x50   :  { %855 = vmatprep.subr.bf16.mxu1 %v854_v2  ;;  %v147_v51 = vld [vmem:[#allocation5 + $0x2b0] sm:$0xff]  ;;  %v796_v52 = vpack.c.bf16 %v121_v44, %v117_v43  ;;  %v1224_v53 = vld [vmem:[#allocation2] sm:$0x3]  ;;  %v798_v56 = vpack.c.bf16 %v130_v48, %v126_v47  ;;  %v125_v57 = vld [vmem:[#allocation5 + $0x200] sm:$0xff] }
  0x51   :  { %789 = vmatpush1.bf16.msra.mxu0 %v788_v26  ;;  %v152_v55 = vld [vmem:[#allocation5 + $0x2d8] sm:$0xff]  ;;  %v129_v58 = vld [vmem:[#allocation5 + $0x220] sm:$0xff]  ;;  %v1228_v59 = vrot.slane %v1224_v53, %v1222_v45  ;;  %v134_v61 = vld [vmem:[#allocation5 + $0x248] sm:$0xff]  ;;  %v872_v63 = vpack.c.bf16 %v147_v51, %v143_v50 }
  0x52   :  { %791 = vmatprep.subr.bf16.mxu0 %v790_v29  ;;  %v156_v60 = vld [vmem:[#allocation5 + $0x2f8] sm:$0xff]  ;;  %v138_v62 = vld [vmem:[#allocation5 + $0x268] sm:$0xff]  ;;  %v151_v0 = vld [vmem:[#allocation5 + $0x2d0] sm:$0xff]  ;;  %v800_v2 = vpack.c.bf16 %v129_v58, %v125_v57 }
  0x53   :  { %857 = vmatpush1.bf16.msra.mxu1 %v856_v10  ;;  %357 = vmatprep.mubr.f32.mxu1 %v1228_v59  ;;  %v155_v1 = vld [vmem:[#allocation5 + $0x2f0] sm:$0xff]  ;;  %v874_v3 = vpack.c.bf16 %v156_v60, %v152_v55  ;;  %v160_v4 = vld [vmem:[#allocation5 + $0x318] sm:$0xff]  ;;  %v802_v5 = vpack.c.bf16 %v138_v62, %v134_v61  ;;  %v133_v6 = vld [vmem:[#allocation5 + $0x240] sm:$0xff] }
  0x54   :  { %859 = vmatprep.subr.bf16.mxu1 %v858_v14  ;;  %286 = vmatprep.mubr.f32.mxu0 %v1228_v59  ;;  %v137_v7 = vld [vmem:[#allocation5 + $0x260] sm:$0xff]  ;;  %v164_v8 = vld [vmem:[#allocation5 + $0x338] sm:$0xff]  ;;  %v142_v9 = vld [vmem:[#allocation5 + $0x288] sm:$0xff]  ;;  %v876_v11 = vpack.c.bf16 %v155_v1, %v151_v0  ;;  %v1233_v0 = vsub.s32 0, %v1219_v32 }
  0x55   :  { %793 = vmatpush1.bf16.msra.mxu0 %v792_v39  ;;  %v146_v10 = vld [vmem:[#allocation5 + $0x2a8] sm:$0xff]  ;;  %v159_v12 = vld [vmem:[#allocation5 + $0x310] sm:$0xff]  ;;  %v804_v14 = vpack.c.bf16 %v137_v7, %v133_v6  ;;  %v878_v15 = vpack.c.bf16 %v164_v8, %v160_v4  ;;  %v168_v16 = vld [vmem:[#allocation5 + $0x358] sm:$0xff] }
  0x56   :  { %795 = vmatprep.subr.bf16.mxu0 %v794_v42  ;;  %v163_v13 = vld [vmem:[#allocation5 + $0x330] sm:$0xff]  ;;  %v806_v17 = vpack.c.bf16 %v146_v10, %v142_v9  ;;  %v141_v18 = vld [vmem:[#allocation5 + $0x280] sm:$0xff]  ;;  %v172_v21 = vld [vmem:[#allocation5 + $0x378] sm:$0xff] }
  0x57   :  { %861 = vmatpush1.bf16.msra.mxu1 %v860_v23  ;;  %v145_v20 = vld [vmem:[#allocation5 + $0x2a0] sm:$0xff]  ;;  %v150_v22 = vld [vmem:[#allocation5 + $0x2c8] sm:$0xff]  ;;  %v880_v24 = vpack.c.bf16 %v163_v13, %v159_v12  ;;  %v167_v25 = vld [vmem:[#allocation5 + $0x350] sm:$0xff]  ;;  %v882_v28 = vpack.c.bf16 %v172_v21, %v168_v16  ;;  %v1237_v13 = vrot.slane %v1224_v53, %v1233_v0 }
  0x58   :  { %863 = vmatprep.subr.bf16.mxu1 %v862_v27  ;;  %v154_v23 = vld [vmem:[#allocation5 + $0x2e8] sm:$0xff]  ;;  %v171_v26 = vld [vmem:[#allocation5 + $0x370] sm:$0xff]  ;;  %v808_v27 = vpack.c.bf16 %v145_v20, %v141_v18  ;;  %v176_v29 = vld [vmem:[#allocation5 + $0x398] sm:$0xff] }
  0x59   :  { %797 = vmatpush1.bf16.msra.mxu0 %v796_v52  ;;  %v810_v30 = vpack.c.bf16 %v154_v23, %v150_v22  ;;  %v149_v31 = vld [vmem:[#allocation5 + $0x2c0] sm:$0xff]  ;;  %v180_v34 = vld [vmem:[#allocation5 + $0x3b8] sm:$0xff]  ;;  %v158_v35 = vld [vmem:[#allocation5 + $0x308] sm:$0xff]  ;;  %v884_v37 = vpack.c.bf16 %v171_v26, %v167_v25 }
  0x5a   :  { %799 = vmatprep.subr.bf16.mxu0 %v798_v56  ;;  %v153_v33 = vld [vmem:[#allocation5 + $0x2e0] sm:$0xff]  ;;  %v175_v38 = vld [vmem:[#allocation5 + $0x390] sm:$0xff]  ;;  %v886_v41 = vpack.c.bf16 %v180_v34, %v176_v29  ;;  %v184_v42 = vld [vmem:[#allocation5 + $0x3d8] sm:$0xff] }
  0x5b   :  { %865 = vmatpush1.bf16.msra.mxu1 %v864_v36  ;;  %v162_v36 = vld [vmem:[#allocation5 + $0x328] sm:$0xff]  ;;  %v179_v39 = vld [vmem:[#allocation5 + $0x3b0] sm:$0xff]  ;;  %v157_v44 = vld [vmem:[#allocation5 + $0x300] sm:$0xff] }
  0x5c   :  { %867 = vmatprep.subr.bf16.mxu1 %v866_v40  ;;  %v812_v40 = vpack.c.bf16 %v153_v33, %v149_v31  ;;  %v814_v43 = vpack.c.bf16 %v162_v36, %v158_v35  ;;  %v161_v46 = vld [vmem:[#allocation5 + $0x320] sm:$0xff]  ;;  %v188_v47 = vld [vmem:[#allocation5 + $0x3f8] sm:$0xff]  ;;  %v166_v48 = vld [vmem:[#allocation5 + $0x348] sm:$0xff]  ;;  %v888_v50 = vpack.c.bf16 %v179_v39, %v175_v38 }
  0x5d   :  { %801 = vmatpush1.bf16.msra.mxu0 %v800_v2  ;;  %v183_v51 = vld [vmem:[#allocation5 + $0x3d0] sm:$0xff]  ;;  %v890_v55 = vpack.c.bf16 %v188_v47, %v184_v42  ;;  %v165_v57 = vld [vmem:[#allocation5 + $0x340] sm:$0xff]  ;;  %v174_v60 = vld [vmem:[#allocation5 + $0x388] sm:$0xff] }
  0x5e   :  { %803 = vmatprep.subr.bf16.mxu0 %v802_v5  ;;  %v187_v52 = vld [vmem:[#allocation5 + $0x3f0] sm:$0xff]  ;;  %v169_v58 = vld [vmem:[#allocation5 + $0x360] sm:$0xff]  ;;  %v178_v61 = vld [vmem:[#allocation5 + $0x3a8] sm:$0xff] }
  0x5f   :  { %869 = vmatpush1.bf16.msra.mxu1 %v868_v49  ;;  %v170_v49 = vld [vmem:[#allocation5 + $0x368] sm:$0xff]  ;;  %v404_v62 = vld [vmem:[#allocation7 + $0x18] sm:$0xff]  ;;  %v892_v1 = vpack.c.bf16 %v187_v52, %v183_v51  ;;  %v820_v2 = vpack.c.bf16 %v169_v58, %v165_v57  ;;  %v177_v4 = vld [vmem:[#allocation5 + $0x3a0] sm:$0xff]  ;;  %v822_v5 = vpack.c.bf16 %v178_v61, %v174_v60 }
  0x60   :  { %871 = vmatprep.subr.bf16.mxu1 %v870_v54  ;;  %v816_v54 = vpack.c.bf16 %v161_v46, %v157_v44  ;;  %v818_v56 = vpack.c.bf16 %v170_v49, %v166_v48  ;;  %v182_v6 = vld [vmem:[#allocation5 + $0x3c8] sm:$0xff]  ;;  %v403_v8 = vld [vmem:[#allocation7 + $0x10] sm:$0xff]  ;;  %v416_v12 = vld [vmem:[#allocation7 + $0x78] sm:$0xff] }
  0x61   :  { %805 = vmatpush1.bf16.msra.mxu0 %v804_v14  ;;  %v407_v9 = vld [vmem:[#allocation7 + $0x30] sm:$0xff]  ;;  %v186_v10 = vld [vmem:[#allocation5 + $0x3e8] sm:$0xff]  ;;  %v185_v16 = vld [vmem:[#allocation5 + $0x3e0] sm:$0xff] }
  0x62   :  { %807 = vmatprep.subr.bf16.mxu0 %v806_v17  ;;  %v960_v17 = vpack.c.bf16 %v407_v9, %v403_v8  ;;  %v826_v18 = vpack.c.bf16 %v186_v10, %v182_v6  ;;  %v402_v20 = vld [vmem:[#allocation7 + $0x8] sm:$0xff]  ;;  %v411_v22 = vld [vmem:[#allocation7 + $0x50] sm:$0xff]  ;;  %v420_v25 = vld [vmem:[#allocation7 + $0x98] sm:$0xff] }
  0x63   :  { %873 = vmatpush1.bf16.msra.mxu1 %v872_v63  ;;  %v408_v63 = vld [vmem:[#allocation7 + $0x38] sm:$0xff]  ;;  %v415_v23 = vld [vmem:[#allocation7 + $0x70] sm:$0xff]  ;;  %v405_v29 = vld [vmem:[#allocation7 + $0x20] sm:$0xff] }
  0x64   :  { %875 = vmatprep.subr.bf16.mxu1 %v874_v3  ;;  %v173_v3 = vld [vmem:[#allocation5 + $0x380] sm:$0xff]  ;;  %v958_v7 = vpack.c.bf16 %v408_v63, %v404_v62  ;;  %v424_v26 = vld [vmem:[#allocation7 + $0xb8] sm:$0xff]  ;;  %v410_v33 = vld [vmem:[#allocation7 + $0x48] sm:$0xff] }
  0x65   :  { %809 = vmatpush1.bf16.msra.mxu0 %v808_v27  ;;  %v824_v14 = vpack.c.bf16 %v177_v4, %v173_v3  ;;  %v966_v34 = vpack.c.bf16 %v424_v26, %v420_v25  ;;  %v419_v35 = vld [vmem:[#allocation7 + $0x90] sm:$0xff]  ;;  %v428_v38 = vld [vmem:[#allocation7 + $0xd8] sm:$0xff]  ;;  %v413_v42 = vld [vmem:[#allocation7 + $0x60] sm:$0xff] }
  0x66   :  { %811 = vmatprep.subr.bf16.mxu0 %v810_v30  ;;  %v964_v30 = vpack.c.bf16 %v415_v23, %v411_v22  ;;  %v423_v36 = vld [vmem:[#allocation7 + $0xb0] sm:$0xff]  ;;  %v432_v39 = vld [vmem:[#allocation7 + $0xf8] sm:$0xff]  ;;  %v418_v46 = vld [vmem:[#allocation7 + $0x88] sm:$0xff] }
  0x67   :  { %877 = vmatpush1.bf16.msra.mxu1 %v876_v11  ;;  %v412_v11 = vld [vmem:[#allocation7 + $0x58] sm:$0xff]  ;;  %v970_v47 = vpack.c.bf16 %v432_v39, %v428_v38  ;;  %v427_v48 = vld [vmem:[#allocation7 + $0xd0] sm:$0xff]  ;;  %v426_v60 = vld [vmem:[#allocation7 + $0xc8] sm:$0xff] }
  0x68   :  { %879 = vmatprep.subr.bf16.mxu1 %v878_v15  ;;  %v181_v15 = vld [vmem:[#allocation5 + $0x3c0] sm:$0xff]  ;;  %v962_v21 = vpack.c.bf16 %v416_v12, %v412_v11  ;;  %v431_v49 = vld [vmem:[#allocation7 + $0xf0] sm:$0xff]  ;;  %v436_v51 = vld [vmem:[#allocation7 + $0x118] sm:$0xff] }
  0x69   :  { %813 = vmatpush1.bf16.msra.mxu0 %v812_v40  ;;  %v828_v27 = vpack.c.bf16 %v185_v16, %v181_v15  ;;  %v440_v52 = vld [vmem:[#allocation7 + $0x138] sm:$0xff]  ;;  %v972_v57 = vpack.c.bf16 %v431_v49, %v427_v48  ;;  %v435_v62 = vld [vmem:[#allocation7 + $0x110] sm:$0xff]  ;;  %v429_v8 = vld [vmem:[#allocation7 + $0xe0] sm:$0xff] }
  0x6a   :  { %815 = vmatprep.subr.bf16.mxu0 %v814_v43  ;;  %v968_v43 = vpack.c.bf16 %v423_v36, %v419_v35  ;;  %v974_v61 = vpack.c.bf16 %v440_v52, %v436_v51  ;;  %v439_v63 = vld [vmem:[#allocation7 + $0x130] sm:$0xff]  ;;  %v448_v3 = vld [vmem:[#allocation7 + $0x178] sm:$0xff]  ;;  %v434_v10 = vld [vmem:[#allocation7 + $0x108] sm:$0xff] }
  0x6b   :  { %881 = vmatpush1.bf16.msra.mxu1 %v880_v24  ;;  %v406_v24 = vld [vmem:[#allocation7 + $0x28] sm:$0xff]  ;;  %v433_v15 = vld [vmem:[#allocation7 + $0x100] sm:$0xff]  ;;  %v447_v26 = vld [vmem:[#allocation7 + $0x170] sm:$0xff] }
  0x6c   :  { %883 = vmatprep.subr.bf16.mxu1 %v882_v28  ;;  %v401_v28 = vld [vmem:[#allocation7] sm:$0xff]  ;;  %v894_v31 = vpack.c.bf16 %v406_v24, %v402_v20  ;;  %v438_v11 = vld [vmem:[#allocation7 + $0x128] sm:$0xff]  ;;  %v443_v24 = vld [vmem:[#allocation7 + $0x150] sm:$0xff] }
  0x6d   :  { %817 = vmatpush1.bf16.msra.mxu0 %v816_v54  ;;  %v896_v40 = vpack.c.bf16 %v405_v29, %v401_v28  ;;  %v437_v16 = vld [vmem:[#allocation7 + $0x120] sm:$0xff]  ;;  %v450_v28 = vld [vmem:[#allocation7 + $0x188] sm:$0xff]  ;;  %v451_v38 = vld [vmem:[#allocation7 + $0x190] sm:$0xff] }
  0x6e   :  { %819 = vmatprep.subr.bf16.mxu0 %v818_v56  ;;  %v421_v56 = vld [vmem:[#allocation7 + $0xa0] sm:$0xff]  ;;  %v912_v20 = vpack.c.bf16 %v437_v16, %v433_v15  ;;  %v454_v29 = vld [vmem:[#allocation7 + $0x1a8] sm:$0xff]  ;;  %v455_v39 = vld [vmem:[#allocation7 + $0x1b0] sm:$0xff] }
  0x6f   :  { %885 = vmatpush1.bf16.msra.mxu1 %v884_v37  ;;  %v414_v37 = vld [vmem:[#allocation7 + $0x68] sm:$0xff]  ;;  %v441_v22 = vld [vmem:[#allocation7 + $0x140] sm:$0xff]  ;;  %v459_v51 = vld [vmem:[#allocation7 + $0x1d0] sm:$0xff] }
  0x70   :  { %887 = vmatprep.subr.bf16.mxu1 %v886_v41  ;;  %v409_v41 = vld [vmem:[#allocation7 + $0x40] sm:$0xff]  ;;  %v898_v44 = vpack.c.bf16 %v414_v37, %v410_v33  ;;  %v456_v33 = vld [vmem:[#allocation7 + $0x1b8] sm:$0xff]  ;;  %v463_v52 = vld [vmem:[#allocation7 + $0x1f0] sm:$0xff] }
  0x71   :  { %821 = vmatpush1.bf16.msra.mxu0 %v820_v2  ;;  %v900_v54 = vpack.c.bf16 %v413_v42, %v409_v41  ;;  %v444_v2 = vld [vmem:[#allocation7 + $0x158] sm:$0xff]  ;;  %v445_v23 = vld [vmem:[#allocation7 + $0x160] sm:$0xff]  ;;  %v458_v41 = vld [vmem:[#allocation7 + $0x1c8] sm:$0xff] }
  0x72   :  { %823 = vmatprep.subr.bf16.mxu0 %v822_v5  ;;  %v976_v5 = vpack.c.bf16 %v439_v63, %v435_v62  ;;  %v978_v9 = vpack.c.bf16 %v448_v3, %v444_v2  ;;  %v916_v25 = vpack.c.bf16 %v445_v23, %v441_v22  ;;  %v453_v35 = vld [vmem:[#allocation7 + $0x1a0] sm:$0xff]  ;;  %v462_v42 = vld [vmem:[#allocation7 + $0x1e8] sm:$0xff]  ;;  %v467_v2 = vld [vmem:[#allocation7 + $0x210] sm:$0xff] }
  0x73   :  { %889 = vmatpush1.bf16.msra.mxu1 %v888_v50  ;;  %v422_v50 = vld [vmem:[#allocation7 + $0xa8] sm:$0xff]  ;;  %v461_v48 = vld [vmem:[#allocation7 + $0x1e0] sm:$0xff]  ;;  %v471_v3 = vld [vmem:[#allocation7 + $0x230] sm:$0xff] }
  0x74   :  { %891 = vmatprep.subr.bf16.mxu1 %v890_v55  ;;  %v417_v55 = vld [vmem:[#allocation7 + $0x80] sm:$0xff]  ;;  %v902_v58 = vpack.c.bf16 %v422_v50, %v418_v46  ;;  %v464_v46 = vld [vmem:[#allocation7 + $0x1f8] sm:$0xff]  ;;  %v475_v15 = vld [vmem:[#allocation7 + $0x250] sm:$0xff] }
  0x75   :  { %825 = vmatpush1.bf16.msra.mxu0 %v824_v14  ;;  %v904_v4 = vpack.c.bf16 %v421_v56, %v417_v55  ;;  %v910_v14 = vpack.c.bf16 %v438_v11, %v434_v10  ;;  %v466_v55 = vld [vmem:[#allocation7 + $0x208] sm:$0xff]  ;;  %v469_v62 = vld [vmem:[#allocation7 + $0x220] sm:$0xff]  ;;  %v479_v16 = vld [vmem:[#allocation7 + $0x270] sm:$0xff] }
  0x76   :  { %827 = vmatprep.subr.bf16.mxu0 %v826_v18  ;;  %v446_v18 = vld [vmem:[#allocation7 + $0x168] sm:$0xff]  ;;  %v473_v10 = vld [vmem:[#allocation7 + $0x240] sm:$0xff]  ;;  %v488_v23 = vld [vmem:[#allocation7 + $0x2b8] sm:$0xff] }
  0x77   :  { %893 = vmatpush1.bf16.msra.mxu1 %v892_v1  ;;  %v430_v1 = vld [vmem:[#allocation7 + $0xe8] sm:$0xff]  ;;  %v477_v11 = vld [vmem:[#allocation7 + $0x260] sm:$0xff] }
  0x78   :  { %959 = vmatprep.subr.bf16.mxu1 %v958_v7  ;;  %v906_v6 = vpack.c.bf16 %v430_v1, %v426_v60  ;;  %v425_v7 = vld [vmem:[#allocation7 + $0xc0] sm:$0xff]  ;;  %v470_v56 = vld [vmem:[#allocation7 + $0x228] sm:$0xff]  ;;  %v472_v60 = vld [vmem:[#allocation7 + $0x238] sm:$0xff] }
  0x79   :  { %829 = vmatpush1.bf16.msra.mxu0 %v828_v27  ;;  %v908_v12 = vpack.c.bf16 %v429_v8, %v425_v7  ;;  %v980_v27 = vpack.c.bf16 %v447_v26, %v443_v24  ;;  %v476_v7 = vld [vmem:[#allocation7 + $0x258] sm:$0xff]  ;;  %v481_v24 = vld [vmem:[#allocation7 + $0x280] sm:$0xff] }
  0x7a   :  { %358 = vmatmul.mubr.f32.vlgmr.msra.gmra.mrb[0].mxu1 %v1237_v13  ;;  %895 = vmatprep.subr.bf16.mxu0 %v894_v31  ;;  %v918_v31 = vpack.c.bf16 %v454_v29, %v450_v28  ;;  %v483_v28 = vld [vmem:[#allocation7 + $0x290] sm:$0xff] }
  0x7b   :  { %961 = vmatpush1.bf16.msra.mxu1 %v960_v17  ;;  %v442_v17 = vld [vmem:[#allocation7 + $0x148] sm:$0xff]  ;;  %v487_v29 = vld [vmem:[#allocation7 + $0x2b0] sm:$0xff] }
  0x7c   :  { %963 = vmatprep.subr.bf16.mxu1 %v962_v21  ;;  %287 = vmatmul.mubr.f32.vlgmr.msra.gmra.mrb[0].mxu0 %v1237_v13  ;;  %v914_v21 = vpack.c.bf16 %v446_v18, %v442_v17  ;;  %v996_v17 = vpack.c.bf16 %v479_v16, %v475_v15  ;;  %v482_v18 = vld [vmem:[#allocation7 + $0x288] sm:$0xff]  ;;  %v517_v15 = vld [vmem:[#allocation7 + $0x3a0] sm:$0xff] }
  0x7d   :  { %897 = vmatpush1.bf16.msra.mxu0 %v896_v40  ;;  %v984_v40 = vpack.c.bf16 %v455_v39, %v451_v38  ;;  %v493_v38 = vld [vmem:[#allocation7 + $0x2e0] sm:$0xff] }
  0x7e   :  { %899 = vmatprep.subr.bf16.mxu0 %v898_v44  ;;  %v922_v44 = vpack.c.bf16 %v462_v42, %v458_v41  ;;  %v491_v41 = vld [vmem:[#allocation7 + $0x2d0] sm:$0xff] }
  0x7f   :  { %965 = vmatpush1.bf16.msra.mxu1 %v964_v30  ;;  %v452_v30 = vld [vmem:[#allocation7 + $0x198] sm:$0xff]  ;;  %v495_v42 = vld [vmem:[#allocation7 + $0x2f0] sm:$0xff] }
  0x80   :  { %967 = vmatprep.subr.bf16.mxu1 %v966_v34  ;;  %v449_v34 = vld [vmem:[#allocation7 + $0x180] sm:$0xff]  ;;  %v982_v36 = vpack.c.bf16 %v456_v33, %v452_v30  ;;  %v1000_v30 = vpack.c.bf16 %v487_v29, %v483_v28  ;;  %v494_v33 = vld [vmem:[#allocation7 + $0x2e8] sm:$0xff] }
  0x81   :  { %901 = vmatpush1.bf16.msra.mxu0 %v900_v54  ;;  %v920_v37 = vpack.c.bf16 %v453_v35, %v449_v34  ;;  %v988_v54 = vpack.c.bf16 %v463_v52, %v459_v51  ;;  %v492_v34 = vld [vmem:[#allocation7 + $0x2d8] sm:$0xff]  ;;  %v501_v51 = vld [vmem:[#allocation7 + $0x320] sm:$0xff] }
  0x82   :  { %903 = vmatprep.subr.bf16.mxu0 %v902_v58  ;;  %v926_v58 = vpack.c.bf16 %v470_v56, %v466_v55  ;;  %v499_v55 = vld [vmem:[#allocation7 + $0x310] sm:$0xff]  ;;  %v521_v28 = vld [vmem:[#allocation7 + $0x3c0] sm:$0xff] }
  0x83   :  { %969 = vmatpush1.bf16.msra.mxu1 %v968_v43  ;;  %v460_v43 = vld [vmem:[#allocation7 + $0x1d8] sm:$0xff]  ;;  %v503_v56 = vld [vmem:[#allocation7 + $0x330] sm:$0xff]  ;;  %v525_v29 = vld [vmem:[#allocation7 + $0x3e0] sm:$0xff] }
  0x84   :  { %971 = vmatprep.subr.bf16.mxu1 %v970_v47  ;;  %v457_v47 = vld [vmem:[#allocation7 + $0x1c0] sm:$0xff]  ;;  %v986_v49 = vpack.c.bf16 %v464_v46, %v460_v43  ;;  %v1004_v43 = vpack.c.bf16 %v495_v42, %v491_v41  ;;  %v502_v46 = vld [vmem:[#allocation7 + $0x328] sm:$0xff] }
  0x85   :  { %905 = vmatpush1.bf16.msra.mxu0 %v904_v4  ;;  %v924_v50 = vpack.c.bf16 %v461_v48, %v457_v47  ;;  %v992_v4 = vpack.c.bf16 %v471_v3, %v467_v2  ;;  %v500_v47 = vld [vmem:[#allocation7 + $0x318] sm:$0xff]  ;;  %v509_v2 = vld [vmem:[#allocation7 + $0x360] sm:$0xff] }
  0x86   :  { %907 = vmatprep.subr.bf16.mxu0 %v906_v6  ;;  %v478_v6 = vld [vmem:[#allocation7 + $0x268] sm:$0xff] }
  0x87   :  { %973 = vmatpush1.bf16.msra.mxu1 %v972_v57  ;;  %v468_v57 = vld [vmem:[#allocation7 + $0x218] sm:$0xff] }
  0x88   :  { %975 = vmatprep.subr.bf16.mxu1 %v974_v61  ;;  %v465_v61 = vld [vmem:[#allocation7 + $0x200] sm:$0xff]  ;;  %v990_v63 = vpack.c.bf16 %v472_v60, %v468_v57  ;;  %v1008_v57 = vpack.c.bf16 %v503_v56, %v499_v55  ;;  %v510_v60 = vld [vmem:[#allocation7 + $0x368] sm:$0xff] }
  0x89   :  { %909 = vmatpush1.bf16.msra.mxu0 %v908_v12  ;;  %v928_v1 = vpack.c.bf16 %v469_v62, %v465_v61  ;;  %v508_v61 = vld [vmem:[#allocation7 + $0x358] sm:$0xff] }
  0x8a   :  { %911 = vmatprep.subr.bf16.mxu0 %v910_v14  ;;  %v932_v14 = vpack.c.bf16 %v477_v11, %v473_v10  ;;  %v516_v10 = vld [vmem:[#allocation7 + $0x398] sm:$0xff] }
  0x8b   :  { %977 = vmatpush1.bf16.msra.mxu1 %v976_v5  ;;  %v474_v5 = vld [vmem:[#allocation7 + $0x248] sm:$0xff] }
  0x8c   :  { %979 = vmatprep.subr.bf16.mxu1 %v978_v9  ;;  %v930_v8 = vpack.c.bf16 %v478_v6, %v474_v5  ;;  %v480_v9 = vld [vmem:[#allocation7 + $0x278] sm:$0xff]  ;;  %v507_v5 = vld [vmem:[#allocation7 + $0x350] sm:$0xff] }
  0x8d   :  { %913 = vmatpush1.bf16.msra.mxu0 %v912_v20  ;;  %v994_v12 = vpack.c.bf16 %v480_v9, %v476_v7  ;;  %v486_v20 = vld [vmem:[#allocation7 + $0x2a8] sm:$0xff]  ;;  %v511_v6 = vld [vmem:[#allocation7 + $0x370] sm:$0xff] }
  0x8e   :  { %915 = vmatprep.subr.bf16.mxu0 %v914_v21  ;;  %v484_v21 = vld [vmem:[#allocation7 + $0x298] sm:$0xff]  ;;  %v934_v22 = vpack.c.bf16 %v486_v20, %v482_v18  ;;  %v1012_v7 = vpack.c.bf16 %v511_v6, %v507_v5  ;;  %v518_v9 = vld [vmem:[#allocation7 + $0x3a8] sm:$0xff]  ;;  %v515_v18 = vld [vmem:[#allocation7 + $0x390] sm:$0xff] }
  0x8f   :  { %981 = vmatpush1.bf16.msra.mxu1 %v980_v27  ;;  %v998_v26 = vpack.c.bf16 %v488_v23, %v484_v21  ;;  %v519_v20 = vld [vmem:[#allocation7 + $0x3b0] sm:$0xff]  ;;  %v522_v21 = vld [vmem:[#allocation7 + $0x3c8] sm:$0xff] }
  0x90   :  { %983 = vmatprep.subr.bf16.mxu1 %v982_v36  ;;  %v496_v36 = vld [vmem:[#allocation7 + $0x2f8] sm:$0xff]  ;;  %v526_v23 = vld [vmem:[#allocation7 + $0x3e8] sm:$0xff] }
  0x91   :  { %917 = vmatpush1.bf16.msra.mxu0 %v916_v25  ;;  %v485_v25 = vld [vmem:[#allocation7 + $0x2a0] sm:$0xff]  ;;  %v1002_v39 = vpack.c.bf16 %v496_v36, %v492_v34  ;;  %v189_v36 = vld [vmem:[%s1274_s2] sm:$0xf] }
  0x92   :  { %919 = vmatprep.subr.bf16.mxu0 %v918_v31  ;;  %v936_v27 = vpack.c.bf16 %v485_v25, %v481_v24  ;;  %v490_v31 = vld [vmem:[#allocation7 + $0x2c8] sm:$0xff]  ;;  %v524_v24 = vld [vmem:[#allocation7 + $0x3d8] sm:$0xff] }
  0x93   :  { %985 = vmatpush1.bf16.msra.mxu1 %v984_v40  ;;  %v938_v35 = vpack.c.bf16 %v494_v33, %v490_v31  ;;  %v528_v25 = vld [vmem:[#allocation7 + $0x3f8] sm:$0xff]  ;;  %v956_v31 = vpack.c.bf16 %v525_v29, %v521_v28  ;;  %v527_v33 = vld [vmem:[#allocation7 + $0x3f0] sm:$0xff] }
  0x94   :  { %987 = vmatprep.subr.bf16.mxu1 %v986_v49  ;;  %v504_v49 = vld [vmem:[#allocation7 + $0x338] sm:$0xff] }
  0x95   :  { %921 = vmatpush1.bf16.msra.mxu0 %v920_v37  ;;  %v489_v37 = vld [vmem:[#allocation7 + $0x2c0] sm:$0xff]  ;;  %v1006_v52 = vpack.c.bf16 %v504_v49, %v500_v47  ;;  %v205_v49 = vrot.slane %v189_v36, %v1233_v0 }
  0x96   :  { %923 = vmatprep.subr.bf16.mxu0 %v922_v44  ;;  %v940_v40 = vpack.c.bf16 %v493_v38, %v489_v37  ;;  %v498_v44 = vld [vmem:[#allocation7 + $0x308] sm:$0xff]  ;;  %v216_v37 = vsub.s32 3, %v1219_v32 }
  0x97   :  { %989 = vmatpush1.bf16.msra.mxu1 %v988_v54  ;;  %v942_v48 = vpack.c.bf16 %v502_v46, %v498_v44 }
  0x98   :  { %991 = vmatprep.subr.bf16.mxu1 %v990_v63  ;;  %v512_v63 = vld [vmem:[#allocation7 + $0x378] sm:$0xff] }
  0x99   :  { %925 = vmatpush1.bf16.msra.mxu0 %v924_v50  ;;  %v497_v50 = vld [vmem:[#allocation7 + $0x300] sm:$0xff]  ;;  %v1010_v3 = vpack.c.bf16 %v512_v63, %v508_v61  ;;  %v1144_v61 = vmov 1966171168  }
  0x9a   :  { %927 = vmatprep.subr.bf16.mxu0 %v926_v58  ;;  %v944_v54 = vpack.c.bf16 %v501_v51, %v497_v50  ;;  %v506_v58 = vld [vmem:[#allocation7 + $0x348] sm:$0xff]  ;;  %v209_v50 = vrot.slane %v189_v36, %v1222_v45 }
  0x9b   :  { %993 = vmatpush1.bf16.msra.mxu1 %v992_v4  ;;  %v946_v62 = vpack.c.bf16 %v510_v60, %v506_v58 }
  0x9c   :  { %995 = vmatprep.subr.bf16.mxu1 %v994_v12  ;;  %v520_v12 = vld [vmem:[#allocation7 + $0x3b8] sm:$0xff] }
  0x9d   :  { %929 = vmatpush1.bf16.msra.mxu0 %v928_v1  ;;  %v505_v1 = vld [vmem:[#allocation7 + $0x340] sm:$0xff]  ;;  %v1014_v16 = vpack.c.bf16 %v520_v12, %v516_v10 }
  0x9e   :  { %931 = vmatprep.subr.bf16.mxu0 %v930_v8  ;;  %v948_v4 = vpack.c.bf16 %v509_v2, %v505_v1  ;;  %v514_v8 = vld [vmem:[#allocation7 + $0x388] sm:$0xff] }
  0x9f   :  { %997 = vmatpush1.bf16.msra.mxu1 %v996_v17  ;;  %v950_v11 = vpack.c.bf16 %v518_v9, %v514_v8 }
  0xa0   :  { %999 = vmatprep.subr.bf16.mxu1 %v998_v26  ;;  %v954_v26 = vpack.c.bf16 %v526_v23, %v522_v21 }
  0xa1   :  { %933 = vmatpush1.bf16.msra.mxu0 %v932_v14  ;;  %v513_v14 = vld [vmem:[#allocation7 + $0x380] sm:$0xff] }
  0xa2   :  { %935 = vmatprep.subr.bf16.mxu0 %v934_v22  ;;  %v952_v17 = vpack.c.bf16 %v517_v15, %v513_v14  ;;  %v1016_v22 = vpack.c.bf16 %v519_v20, %v515_v18 }
  0xa3   :  { %1001 = vmatpush1.bf16.msra.mxu1 %v1000_v30  ;;  %v523_v30 = vld [vmem:[#allocation7 + $0x3d0] sm:$0xff] }
  0xa4   :  { %1003 = vmatprep.subr.bf16.mxu1 %v1002_v39  ;;  %v1020_v34 = vpack.c.bf16 %v527_v33, %v523_v30  ;;  %v217_v39 = vrot.slane %v189_v36, %v216_v37 }
  0xa5   :  { %937 = vmatpush1.bf16.msra.mxu0 %v936_v27  ;;  %v1018_v27 = vpack.c.bf16 %v528_v25, %v524_v24 }
  0xa6   :  { %939 = vmatprep.subr.bf16.mxu0 %v938_v35  ;;  %v212_v35 = vsub.s32 2, %v1219_v32 }
  0xa7   :  { %1005 = vmatpush1.bf16.msra.mxu1 %v1004_v43 }
  0xa8   :  { %1007 = vmatprep.subr.bf16.mxu1 %v1006_v52  ;;  %v213_v38 = vrot.slane %v189_v36, %v212_v35 }
  0xa9   :  { %941 = vmatpush1.bf16.msra.mxu0 %v940_v40 }
  0xaa   :  { %943 = vmatprep.subr.bf16.mxu0 %v942_v48 }
  0xab   :  { %1009 = vmatpush1.bf16.msra.mxu1 %v1008_v57 }
  0xac   :  { %1011 = vmatprep.subr.bf16.mxu1 %v1010_v3 }
  0xad   :  { %945 = vmatpush1.bf16.msra.mxu0 %v944_v54 }
  0xae   :  { %947 = vmatprep.subr.bf16.mxu0 %v946_v62  ;;  %v386_v62 = vunpack.c.l.s4 %v1144_v61 }
  0xaf   :  { %1013 = vmatpush1.bf16.msra.mxu1 %v1012_v7 }
  0xb0   :  { %1015 = vmatprep.subr.bf16.mxu1 %v1014_v16  ;;  %v387_v2 = vunpack.c.0.s8 %v386_v62 }
  0xb1   :  { %949 = vmatpush1.bf16.msra.mxu0 %v948_v4 }
  0xb2   :  { %951 = vmatprep.subr.bf16.mxu0 %v950_v11  ;;  %v390_v7 = vsub.s32 %v387_v2, %v1219_v32 }
  0xb3   :  { %1017 = vmatpush1.bf16.msra.mxu1 %v1016_v22 }
  0xb4   :  { %1019 = vmatprep.subr.bf16.mxu1 %v1018_v27 }
  0xb5   :  { %953 = vmatpush1.bf16.msra.mxu0 %v952_v17 }
  0xb6   :  { %955 = vmatprep.subr.bf16.mxu0 %v954_v26 }
  0xb7   :  { %1021 = vmatpush1.bf16.msra.mxu1 %v1020_v34 }
  0xb9   :  { %957 = vmatpush1.bf16.msra.mxu0 %v956_v31 }
 0x14d   :  { %v359_v40 = vpop.f32.mrb[0].mxu1 }
 0x14e   :  { %v360_v41 = vadd.f32 %v359_v40, %v213_v38  ;;  %v361_v42 = vpop.f32.mrb[1].mxu1 }
 0x14f   :  { %v362_v43 = vadd.f32 %v361_v42, %v217_v39  ;;  %v288_v47 = vpop.f32.mrb[0].mxu0 }
 0x150   :  { %v762_v44 = vmul.f32 -1.442695, %v360_v41  ;;  %v290_v48 = vpop.f32.mrb[1].mxu0  ;;  %v289_v56 = vadd.f32 %v288_v47, %v205_v49 }
 0x151   :  { %v763_v46 = vmul.f32 -1.442695, %v362_v43  ;;  %v291_v57 = vadd.f32 %v290_v48, %v209_v50 }
 0x152   :  { %1029 = vpow2.f32 %v762_v44  ;;  %v364_v58 = vmax.f32 %v289_v56, 0.0 }
 0x153   :  { %1031 = vpow2.f32 %v763_v46  ;;  %v365_v60 = vmax.f32 %v291_v57, 0.0 }
 0x154   :  { %v378_v63 = vsub.f32 %v364_v58, %v1237_v13 }
 0x155   :  { %v379_v1 = vsub.f32 %v365_v60, %v1228_v59  ;;  %v529_v59 = vld [vmem:[%s1276_s4] sm:$0xf]  ;;  %s1145_s4 = smov [#allocation8]  }
 0x156   :  { %v553_v13 = vrot.slane %v529_v59, %v212_v35  ;;  %v557_v15 = vrot.slane %v529_v59, %v216_v37  ;;  %v545_v24 = vrot.slane %v529_v59, %v1233_v0  ;;  %v549_v27 = vrot.slane %v529_v59, %v1222_v45  ;;  %s752_s6 = sshll.u32 %s1145_s4, 4  ;;  %s753_s6 = int_to_ptr.vmem [resolvable:$true] %s752_s6 }
 0x157   :  { %s1111_s7 = scalar_lea.vmem %s753_s6, 32  ;;  %p1116_p11 = scmp.lt.s32.totalorder %s753_s6, %s753_s6 }
 0x158   :  { %p1112_p10 = scmp.ne.s32.totalorder %s753_s6, %s1111_s7  ;;  %p1117_p12 = scmp.lt.s32.totalorder %s1111_s7, %s1111_s7 }
 0x15a   :  { %p1118_p13 = por %p1117_p12, %p1116_p11 }
 0x15c   :  { %v1030_v51 = vpop.eup %1029  ;;  %p1119_p0 = pnand %p1118_p13, %p1112_p10 }
 0x15d   :  { %v1032_v52 = vpop.eup %1031  ;;  %v372_v54 = vadd.f32 1.0, %v1030_v51 }
 0x15e   :  { %v373_v55 = vadd.f32 1.0, %v1032_v52 }
 0x15f   :  { %1033 = vrcp.f32 %v372_v54 }
 0x160   :  { %1035 = vrcp.f32 %v373_v55 }
 0x169   :  { %v1034_v3 = vpop.eup %1033 }
 0x16a   :  { %v1036_v4 = vpop.eup %1035  ;;  %v380_v5 = vmul.f32 %v1034_v3, %v378_v63 }
 0x16b   :  { %v381_v6 = vmul.f32 %v1036_v4, %v379_v1 }
 0x16d   :  { %v384_v8 = vcombine.low %v380_v5, %v381_v6 }
 0x16f   :  { %v391_v9 = vrot.slane %v384_v8, %v390_v7 }
 0x171   :  { %v398_v10 = vrot.slane %v391_v9, %v390_v7 }
 0x173   :  { %v400_v11 = vadd.f32 %v398_v10, %v1224_v53 }
 0x175   :  { %v538_v12 = vrot.slane %v400_v11, %v1222_v45  ;;  %v534_v14 = vrot.slane %v400_v11, %v1233_v0 }
 0x177   :  { %626 = vmatprep.mubr.f32.mxu0 %v538_v12  ;;  %697 = vmatprep.mubr.f32.mxu1 %v538_v12 }
 0x178   :  { %627 = vmatmul.mubr.f32.vlgmr.msra.gmra.mrb[2].mxu0 %v534_v14  ;;  %698 = vmatmul.mubr.f32.vlgmr.msra.gmra.mrb[2].mxu1 %v534_v14 }
 0x24b   :  { %v628_v32 = vpop.f32.mrb[2].mxu0  ;;  %v699_v16 = vpop.f32.mrb[2].mxu1 }
 0x24c   :  { %v700_v17 = vadd.f32 %v699_v16, %v553_v13  ;;  %v630_v18 = vpop.f32.mrb[3].mxu0  ;;  %v701_v20 = vpop.f32.mrb[3].mxu1  ;;  %v629_v29 = vadd.f32 %v628_v32, %v545_v24 }
 0x24d   :  { %v702_v53 = vadd.f32 %v701_v20, %v557_v15  ;;  %v631_v30 = vadd.f32 %v630_v18, %v549_v27 }
 0x24e   :  { %v764_v21 = vmul.f32 -1.442695, %v700_v17  ;;  %v704_v31 = vmax.f32 %v629_v29, 0.0 }
 0x24f   :  { %v765_v22 = vmul.f32 -1.442695, %v702_v53  ;;  %v705_v33 = vmax.f32 %v631_v30, 0.0 }
 0x250   :  { %1037 = vpow2.f32 %v764_v21  ;;  %v718_v34 = vsub.f32 %v704_v31, %v534_v14 }
 0x251   :  { %1039 = vpow2.f32 %v765_v22  ;;  %v719_v36 = vsub.f32 %v705_v33, %v538_v12 }
 0x25a   :  { %v1038_v23 = vpop.eup %1037 }
 0x25b   :  { %v1040_v25 = vpop.eup %1039  ;;  %v712_v26 = vadd.f32 1.0, %v1038_v23 }
 0x25c   :  { %v713_v28 = vadd.f32 1.0, %v1040_v25 }
 0x25d   :  { %1041 = vrcp.f32 %v712_v26 }
 0x25e   :  { %1043 = vrcp.f32 %v713_v28 }
 0x267   :  { %v1042_v35 = vpop.eup %1041 }
 0x268   :  { %v1044_v37 = vpop.eup %1043  ;;  %v720_v38 = vmul.f32 %v1042_v35, %v718_v34 }
 0x269   :  { %v721_v39 = vmul.f32 %v1044_v37, %v719_v36 }
 0x26b   :  { %v724_v40 = vcombine.low %v720_v38, %v721_v39 }
 0x26d   :  { %v731_v41 = vrot.slane %v724_v40, %v390_v7 }
 0x26f   :  { %v738_v0 = vrot.slane %v731_v41, %v390_v7 }
 0x271   :  { %v740_v45 = vadd.f32 %v738_v0, %v400_v11 }
 0x273   :  { %745 = vst.msk [vmem:[#allocation8] sm:$0x3] %vm743_vm0, %v740_v45 }
 0x274   :  { %1122 = shalt.err (!%p1119_p0)
}
 0x275   :  { %s1123_s10 = scalar_lea.hbm %s1277_s5, 32 }
 0x276   :  { %p1124_p1 = scmp.ne.s32.totalorder %s1277_s5, %s1123_s10  ;;  %p1127_p2 = scmp.lt.u32.totalorder %s1123_s10, %s1277_s5 }
 0x278   :  { %p1129_p3 = pnand %p1127_p2, %p1124_p1 }
 0x27a   :  { %1132 = shalt.err (!%p1129_p3)
}
 0x27b   :  { %755 = dma.vmem_to_hbm [thread:$0]  %s753_s6, 32, %s1277_s5, [#allocation4]  }
 0x27c   :  { %1137 = dma.done.wait [#allocation4], 32  }
 0x27d   :  { %1138 = vsyncadd [#allocation4], 4294967264 }
 0x27e   :  { %759 = vsyncpa [#allocation3], 1 }
 0x27f   :  { %760 = vsyncpa [#allocation6], 1 }
 0x280   :  { %761 = vsyncpa [#allocation4], 1 }

// kernel: tpu_custom_call.1
= control target key start
LH: loop header
LB: loop body
LE: loop exit
PB: predicated region body
PF: predicated region fallthrough
CT: control target
= control target key end

     0   :  { %10 = vsyncpa [#allocation3], 0  ;;  %s1272_s0 = inlined_call_operand.hbm [shape: f32[1,256], index: 0, kind: input, shape index: {}]   ;;  %s1273_s1 = inlined_call_operand.hbm [shape: f32[256,512], index: 1, kind: input, shape index: {}]   ;;  %s1274_s2 = inlined_call_operand.vmem [shape: f32[1,512], index: 2, kind: input, shape index: {}]   ;;  %s1275_s3 = inlined_call_operand.hbm [shape: f32[256,512], index: 3, kind: input, shape index: {}]   ;;  %s1276_s4 = inlined_call_operand.vmem [shape: f32[1,512], index: 4, kind: input, shape index: {}]   ;;  %s1277_s5 = inlined_call_operand.hbm [shape: f32[1,256], index: 5, kind: output, shape index: {}]  }
   0x1   :  { %11 = vsyncpa [#allocation6], 0 }
   0x2   :  { %12 = vsyncpa [#allocation4], 0  ;;  %s1139_s18 = smov [#allocation5]   ;;  %s1045_s22 = scalar_lea.hbm %s1273_s1, 16384 }
   0x3   :  { %s28_s19 = sshll.u32 %s1139_s18, 4  ;;  %p1046_p0 = scmp.ne.s32.totalorder %s1273_s1, %s1045_s22  ;;  %s29_s19 = int_to_ptr.vmem [resolvable:$true] %s28_s19 }
   0x4   :  { %p1049_p1 = scmp.lt.u32.totalorder %s1045_s22, %s1273_s1 }
   0x6   :  { %p1051_p2 = pnand %p1049_p1, %p1046_p0 }
   0x8   :  { %1054 = shalt.err (!%p1051_p2)
}
   0x9   :  { %s1055_s27 = scalar_lea.vmem %s29_s19, 16384  ;;  %p1060_p4 = scmp.lt.s32.totalorder %s29_s19, %s29_s19 }
   0xa   :  { %p1056_p3 = scmp.ne.s32.totalorder %s29_s19, %s1055_s27  ;;  %p1061_p5 = scmp.lt.s32.totalorder %s1055_s27, %s1055_s27 }
   0xc   :  { %p1062_p6 = por %p1061_p5, %p1060_p4 }
   0xe   :  { %p1063_p7 = pnand %p1062_p6, %p1056_p3 }
  0x10   :  { %1066 = shalt.err (!%p1063_p7)
}
  0x11   :  { %s1140_s28 = smov 512   ;;  %s1141_s29 = smov 32  }
  0x12   :  { %34 = dma.hbm_to_vmem [thread:$0]  %s1273_s1, 16384, %s29_s19, [#allocation6], %s1140_s28, %s1140_s28, %s1141_s29  }
  0x13   :  { %s1142_s7 = smov [#allocation2]   ;;  %s1143_s9 = smov [#allocation7]  }
  0x14   :  { %s19_s8 = sshll.u32 %s1142_s7, 4  ;;  %s42_s10 = sshll.u32 %s1143_s9, 4  ;;  %s20_s8 = int_to_ptr.vmem [resolvable:$true] %s19_s8  ;;  %s43_s10 = int_to_ptr.vmem [resolvable:$true] %s42_s10 }
  0x15   :  { %s1067_s13 = scalar_lea.hbm %s1272_s0, 32 }
  0x16   :  { %p1068_p8 = scmp.ne.s32.totalorder %s1272_s0, %s1067_s13  ;;  %p1071_p9 = scmp.lt.u32.totalorder %s1067_s13, %s1272_s0 }
  0x18   :  { %p1073_p10 = pnand %p1071_p9, %p1068_p8 }
  0x1a   :  { %1076 = shalt.err (!%p1073_p10)
}
  0x1b   :  { %s1077_s1 = scalar_lea.vmem %s20_s8, 32  ;;  %p1082_p12 = scmp.lt.s32.totalorder %s20_s8, %s20_s8 }
  0x1c   :  { %p1078_p11 = scmp.ne.s32.totalorder %s20_s8, %s1077_s1  ;;  %p1083_p13 = scmp.lt.s32.totalorder %s1077_s1, %s1077_s1 }
  0x1e   :  { %p1084_p0 = por %p1083_p13, %p1082_p12 }
  0x20   :  { %p1085_p1 = pnand %p1084_p0, %p1078_p11 }
  0x22   :  { %1088 = shalt.err (!%p1085_p1)
}
  0x23   :  { %22 = dma.hbm_to_vmem [thread:$0]  %s1272_s0, 32, %s20_s8, [#allocation3]  }
  0x24   :  { %s1089_s22 = scalar_lea.hbm %s1275_s3, 16384 }
  0x25   :  { %p1090_p2 = scmp.ne.s32.totalorder %s1275_s3, %s1089_s22  ;;  %p1093_p3 = scmp.lt.u32.totalorder %s1089_s22, %s1275_s3 }
  0x27   :  { %p1095_p4 = pnand %p1093_p3, %p1090_p2 }
  0x29   :  { %1098 = shalt.err (!%p1095_p4)
}
  0x2a   :  { %s1099_s27 = scalar_lea.vmem %s43_s10, 16384  ;;  %p1104_p6 = scmp.lt.s32.totalorder %s43_s10, %s43_s10 }
  0x2b   :  { %p1100_p5 = scmp.ne.s32.totalorder %s43_s10, %s1099_s27  ;;  %p1105_p7 = scmp.lt.s32.totalorder %s1099_s27, %s1099_s27 }
  0x2d   :  { %p1106_p8 = por %p1105_p7, %p1104_p6 }
  0x2f   :  { %p1107_p9 = pnand %p1106_p8, %p1100_p5 }
  0x31   :  { %1110 = shalt.err (!%p1107_p9)
}
  0x32   :  { %48 = dma.hbm_to_vmem [thread:$0]  %s1275_s3, 16384, %s43_s10, [#allocation6], %s1140_s28, %s1140_s28, %s1141_s29  }
  0x33   :  { %1133 = dma.done.wait [#allocation3], 32  }
  0x34   :  { %1134 = vsyncadd [#allocation3], 4294967264 }
  0x35   :  { %1135 = dma.done.wait [#allocation6], 32768  }
  0x36   :  { %1136 = vsyncadd [#allocation6], 4294934528  ;;  %v64_v0 = vld [vmem:[#allocation5 + $0x18] sm:$0xff]  ;;  %v63_v2 = vld [vmem:[#allocation5 + $0x10] sm:$0xff] }
  0x37   :  { %v68_v1 = vld [vmem:[#allocation5 + $0x38] sm:$0xff]  ;;  %v67_v4 = vld [vmem:[#allocation5 + $0x30] sm:$0xff]  ;;  %v62_v19 = vld [vmem:[#allocation5 + $0x8] sm:$0xff] }
  0x38   :  { %v830_v3 = vpack.c.bf16 %v68_v1, %v64_v0  ;;  %v72_v5 = vld [vmem:[#allocation5 + $0x58] sm:$0xff]  ;;  %v832_v7 = vpack.c.bf16 %v67_v4, %v63_v2  ;;  %v71_v9 = vld [vmem:[#allocation5 + $0x50] sm:$0xff]  ;;  %v66_v20 = vld [vmem:[#allocation5 + $0x28] sm:$0xff] }
  0x39   :  { %v76_v6 = vld [vmem:[#allocation5 + $0x78] sm:$0xff]  ;;  %v75_v10 = vld [vmem:[#allocation5 + $0x70] sm:$0xff]  ;;  %v766_v23 = vpack.c.bf16 %v66_v20, %v62_v19  ;;  %v61_v24 = vld [vmem:[#allocation5] sm:$0xff]  ;;  %v191_v19 = vlaneseq }
  0x3a   :  { %v834_v8 = vpack.c.bf16 %v76_v6, %v72_v5  ;;  %v80_v11 = vld [vmem:[#allocation5 + $0x98] sm:$0xff]  ;;  %831 = vmatprep.subr.bf16.mxu1 %v830_v3  ;;  %v836_v13 = vpack.c.bf16 %v75_v10, %v71_v9  ;;  %v79_v15 = vld [vmem:[#allocation5 + $0x90] sm:$0xff]  ;;  %v65_v28 = vld [vmem:[#allocation5 + $0x20] sm:$0xff] }
  0x3b   :  { %v84_v12 = vld [vmem:[#allocation5 + $0xb8] sm:$0xff]  ;;  %833 = vmatpush1.bf16.msra.mxu1 %v832_v7  ;;  %v83_v16 = vld [vmem:[#allocation5 + $0xb0] sm:$0xff]  ;;  %767 = vmatprep.subr.bf16.mxu0 %v766_v23  ;;  %v768_v30 = vpack.c.bf16 %v65_v28, %v61_v24  ;;  %v70_v31 = vld [vmem:[#allocation5 + $0x48] sm:$0xff]  ;;  %vm743_vm0 = vcmp.lt.s32.totalorder %v191_v19, 256 }
  0x3c   :  { %835 = vmatprep.subr.bf16.mxu1 %v834_v8  ;;  %v838_v14 = vpack.c.bf16 %v84_v12, %v80_v11  ;;  %v88_v17 = vld [vmem:[#allocation5 + $0xd8] sm:$0xff]  ;;  %v840_v21 = vpack.c.bf16 %v83_v16, %v79_v15  ;;  %v87_v22 = vld [vmem:[#allocation5 + $0xd0] sm:$0xff]  ;;  %v74_v32 = vld [vmem:[#allocation5 + $0x68] sm:$0xff] }
  0x3d   :  { %v92_v18 = vld [vmem:[#allocation5 + $0xf8] sm:$0xff]  ;;  %v91_v26 = vld [vmem:[#allocation5 + $0xf0] sm:$0xff]  ;;  %v770_v33 = vpack.c.bf16 %v74_v32, %v70_v31  ;;  %v69_v34 = vld [vmem:[#allocation5 + $0x40] sm:$0xff]  ;;  %769 = vmatpush1.bf16.msra.mxu0 %v768_v30  ;;  %v1219_v32 = vshrl.u32 %v191_v19, 7 }
  0x3e   :  { %v842_v25 = vpack.c.bf16 %v92_v18, %v88_v17  ;;  %v96_v27 = vld [vmem:[#allocation5 + $0x118] sm:$0xff]  ;;  %v73_v35 = vld [vmem:[#allocation5 + $0x60] sm:$0xff]  ;;  %v844_v36 = vpack.c.bf16 %v91_v26, %v87_v22  ;;  %v95_v37 = vld [vmem:[#allocation5 + $0x110] sm:$0xff] }
  0x3f   :  { %837 = vmatpush1.bf16.msra.mxu1 %v836_v13  ;;  %v100_v29 = vld [vmem:[#allocation5 + $0x138] sm:$0xff]  ;;  %v772_v38 = vpack.c.bf16 %v73_v35, %v69_v34  ;;  %v78_v39 = vld [vmem:[#allocation5 + $0x88] sm:$0xff]  ;;  %v99_v41 = vld [vmem:[#allocation5 + $0x130] sm:$0xff]  ;;  %771 = vmatprep.subr.bf16.mxu0 %v770_v33 }
  0x40   :  { %839 = vmatprep.subr.bf16.mxu1 %v838_v14  ;;  %v846_v40 = vpack.c.bf16 %v100_v29, %v96_v27  ;;  %v104_v42 = vld [vmem:[#allocation5 + $0x158] sm:$0xff]  ;;  %v82_v43 = vld [vmem:[#allocation5 + $0xa8] sm:$0xff]  ;;  %v77_v46 = vld [vmem:[#allocation5 + $0x80] sm:$0xff]  ;;  %v848_v50 = vpack.c.bf16 %v99_v41, %v95_v37 }
  0x41   :  { %v108_v44 = vld [vmem:[#allocation5 + $0x178] sm:$0xff]  ;;  %v774_v45 = vpack.c.bf16 %v82_v43, %v78_v39  ;;  %v81_v47 = vld [vmem:[#allocation5 + $0xa0] sm:$0xff]  ;;  %v86_v48 = vld [vmem:[#allocation5 + $0xc8] sm:$0xff]  ;;  %773 = vmatpush1.bf16.msra.mxu0 %v772_v38 }
  0x42   :  { %v90_v49 = vld [vmem:[#allocation5 + $0xe8] sm:$0xff]  ;;  %v103_v51 = vld [vmem:[#allocation5 + $0x150] sm:$0xff]  ;;  %v776_v53 = vpack.c.bf16 %v81_v47, %v77_v46  ;;  %v850_v54 = vpack.c.bf16 %v108_v44, %v104_v42  ;;  %v112_v55 = vld [vmem:[#allocation5 + $0x198] sm:$0xff] }
  0x43   :  { %841 = vmatpush1.bf16.msra.mxu1 %v840_v21  ;;  %v107_v52 = vld [vmem:[#allocation5 + $0x170] sm:$0xff]  ;;  %775 = vmatprep.subr.bf16.mxu0 %v774_v45  ;;  %v778_v56 = vpack.c.bf16 %v90_v49, %v86_v48  ;;  %v85_v57 = vld [vmem:[#allocation5 + $0xc0] sm:$0xff]  ;;  %v116_v59 = vld [vmem:[#allocation5 + $0x1b8] sm:$0xff]  ;;  %v1222_v45 = vsub.s32 1, %v1219_v32 }
  0x44   :  { %843 = vmatprep.subr.bf16.mxu1 %v842_v25  ;;  %v89_v58 = vld [vmem:[#allocation5 + $0xe0] sm:$0xff]  ;;  %v94_v60 = vld [vmem:[#allocation5 + $0x108] sm:$0xff]  ;;  %v852_v62 = vpack.c.bf16 %v107_v52, %v103_v51  ;;  %v111_v63 = vld [vmem:[#allocation5 + $0x190] sm:$0xff]  ;;  %v854_v2 = vpack.c.bf16 %v116_v59, %v112_v55 }
  0x45   :  { %v98_v61 = vld [vmem:[#allocation5 + $0x128] sm:$0xff]  ;;  %v115_v0 = vld [vmem:[#allocation5 + $0x1b0] sm:$0xff]  ;;  %777 = vmatpush1.bf16.msra.mxu0 %v776_v53  ;;  %v780_v1 = vpack.c.bf16 %v89_v58, %v85_v57  ;;  %v120_v3 = vld [vmem:[#allocation5 + $0x1d8] sm:$0xff] }
  0x46   :  { %779 = vmatprep.subr.bf16.mxu0 %v778_v56  ;;  %v782_v4 = vpack.c.bf16 %v98_v61, %v94_v60  ;;  %v93_v5 = vld [vmem:[#allocation5 + $0x100] sm:$0xff]  ;;  %v124_v7 = vld [vmem:[#allocation5 + $0x1f8] sm:$0xff]  ;;  %v102_v8 = vld [vmem:[#allocation5 + $0x148] sm:$0xff]  ;;  %v856_v10 = vpack.c.bf16 %v115_v0, %v111_v63 }
  0x47   :  { %845 = vmatpush1.bf16.msra.mxu1 %v844_v36  ;;  %v97_v6 = vld [vmem:[#allocation5 + $0x120] sm:$0xff]  ;;  %v106_v9 = vld [vmem:[#allocation5 + $0x168] sm:$0xff]  ;;  %v119_v11 = vld [vmem:[#allocation5 + $0x1d0] sm:$0xff]  ;;  %v858_v14 = vpack.c.bf16 %v124_v7, %v120_v3 }
  0x48   :  { %847 = vmatprep.subr.bf16.mxu1 %v846_v40  ;;  %v123_v12 = vld [vmem:[#allocation5 + $0x1f0] sm:$0xff]  ;;  %v784_v13 = vpack.c.bf16 %v97_v6, %v93_v5  ;;  %v128_v15 = vld [vmem:[#allocation5 + $0x218] sm:$0xff]  ;;  %v786_v16 = vpack.c.bf16 %v106_v9, %v102_v8  ;;  %v101_v17 = vld [vmem:[#allocation5 + $0x140] sm:$0xff] }
  0x49   :  { %781 = vmatpush1.bf16.msra.mxu0 %v780_v1  ;;  %v105_v18 = vld [vmem:[#allocation5 + $0x160] sm:$0xff]  ;;  %v132_v20 = vld [vmem:[#allocation5 + $0x238] sm:$0xff]  ;;  %v110_v21 = vld [vmem:[#allocation5 + $0x188] sm:$0xff]  ;;  %v860_v23 = vpack.c.bf16 %v123_v12, %v119_v11 }
  0x4a   :  { %783 = vmatprep.subr.bf16.mxu0 %v782_v4  ;;  %v114_v22 = vld [vmem:[#allocation5 + $0x1a8] sm:$0xff]  ;;  %v127_v24 = vld [vmem:[#allocation5 + $0x210] sm:$0xff]  ;;  %v788_v26 = vpack.c.bf16 %v105_v18, %v101_v17  ;;  %v862_v27 = vpack.c.bf16 %v132_v20, %v128_v15  ;;  %v136_v28 = vld [vmem:[#allocation5 + $0x258] sm:$0xff] }
  0x4b   :  { %849 = vmatpush1.bf16.msra.mxu1 %v848_v50  ;;  %v131_v25 = vld [vmem:[#allocation5 + $0x230] sm:$0xff]  ;;  %v790_v29 = vpack.c.bf16 %v114_v22, %v110_v21  ;;  %v109_v30 = vld [vmem:[#allocation5 + $0x180] sm:$0xff]  ;;  %v140_v33 = vld [vmem:[#allocation5 + $0x278] sm:$0xff] }
  0x4c   :  { %851 = vmatprep.subr.bf16.mxu1 %v850_v54  ;;  %v113_v31 = vld [vmem:[#allocation5 + $0x1a0] sm:$0xff]  ;;  %v118_v34 = vld [vmem:[#allocation5 + $0x1c8] sm:$0xff]  ;;  %v864_v36 = vpack.c.bf16 %v131_v25, %v127_v24  ;;  %v135_v37 = vld [vmem:[#allocation5 + $0x250] sm:$0xff]  ;;  %v866_v40 = vpack.c.bf16 %v140_v33, %v136_v28 }
  0x4d   :  { %785 = vmatpush1.bf16.msra.mxu0 %v784_v13  ;;  %v122_v35 = vld [vmem:[#allocation5 + $0x1e8] sm:$0xff]  ;;  %v139_v38 = vld [vmem:[#allocation5 + $0x270] sm:$0xff]  ;;  %v792_v39 = vpack.c.bf16 %v113_v31, %v109_v30  ;;  %v144_v41 = vld [vmem:[#allocation5 + $0x298] sm:$0xff] }
  0x4e   :  { %787 = vmatprep.subr.bf16.mxu0 %v786_v16  ;;  %v794_v42 = vpack.c.bf16 %v122_v35, %v118_v34  ;;  %v117_v43 = vld [vmem:[#allocation5 + $0x1c0] sm:$0xff]  ;;  %v148_v46 = vld [vmem:[#allocation5 + $0x2b8] sm:$0xff]  ;;  %v126_v47 = vld [vmem:[#allocation5 + $0x208] sm:$0xff]  ;;  %v868_v49 = vpack.c.bf16 %v139_v38, %v135_v37 }
  0x4f   :  { %853 = vmatpush1.bf16.msra.mxu1 %v852_v62  ;;  %v121_v44 = vld [vmem:[#allocation5 + $0x1e0] sm:$0xff]  ;;  %v130_v48 = vld [vmem:[#allocation5 + $0x228] sm:$0xff]  ;;  %v143_v50 = vld [vmem:[#allocation5 + $0x290] sm:$0xff]  ;;  %v870_v54 = vpack.c.bf16 %v148_v46, %v144_v41 }
  0x50   :  { %855 = vmatprep.subr.bf16.mxu1 %v854_v2  ;;  %v147_v51 = vld [vmem:[#allocation5 + $0x2b0] sm:$0xff]  ;;  %v796_v52 = vpack.c.bf16 %v121_v44, %v117_v43  ;;  %v1224_v53 = vld [vmem:[#allocation2] sm:$0x3]  ;;  %v798_v56 = vpack.c.bf16 %v130_v48, %v126_v47  ;;  %v125_v57 = vld [vmem:[#allocation5 + $0x200] sm:$0xff] }
  0x51   :  { %789 = vmatpush1.bf16.msra.mxu0 %v788_v26  ;;  %v152_v55 = vld [vmem:[#allocation5 + $0x2d8] sm:$0xff]  ;;  %v129_v58 = vld [vmem:[#allocation5 + $0x220] sm:$0xff]  ;;  %v1228_v59 = vrot.slane %v1224_v53, %v1222_v45  ;;  %v134_v61 = vld [vmem:[#allocation5 + $0x248] sm:$0xff]  ;;  %v872_v63 = vpack.c.bf16 %v147_v51, %v143_v50 }
  0x52   :  { %791 = vmatprep.subr.bf16.mxu0 %v790_v29  ;;  %v156_v60 = vld [vmem:[#allocation5 + $0x2f8] sm:$0xff]  ;;  %v138_v62 = vld [vmem:[#allocation5 + $0x268] sm:$0xff]  ;;  %v151_v0 = vld [vmem:[#allocation5 + $0x2d0] sm:$0xff]  ;;  %v800_v2 = vpack.c.bf16 %v129_v58, %v125_v57 }
  0x53   :  { %857 = vmatpush1.bf16.msra.mxu1 %v856_v10  ;;  %357 = vmatprep.mubr.f32.mxu1 %v1228_v59  ;;  %v155_v1 = vld [vmem:[#allocation5 + $0x2f0] sm:$0xff]  ;;  %v874_v3 = vpack.c.bf16 %v156_v60, %v152_v55  ;;  %v160_v4 = vld [vmem:[#allocation5 + $0x318] sm:$0xff]  ;;  %v802_v5 = vpack.c.bf16 %v138_v62, %v134_v61  ;;  %v133_v6 = vld [vmem:[#allocation5 + $0x240] sm:$0xff] }
  0x54   :  { %859 = vmatprep.subr.bf16.mxu1 %v858_v14  ;;  %286 = vmatprep.mubr.f32.mxu0 %v1228_v59  ;;  %v137_v7 = vld [vmem:[#allocation5 + $0x260] sm:$0xff]  ;;  %v164_v8 = vld [vmem:[#allocation5 + $0x338] sm:$0xff]  ;;  %v142_v9 = vld [vmem:[#allocation5 + $0x288] sm:$0xff]  ;;  %v876_v11 = vpack.c.bf16 %v155_v1, %v151_v0  ;;  %v1233_v0 = vsub.s32 0, %v1219_v32 }
  0x55   :  { %793 = vmatpush1.bf16.msra.mxu0 %v792_v39  ;;  %v146_v10 = vld [vmem:[#allocation5 + $0x2a8] sm:$0xff]  ;;  %v159_v12 = vld [vmem:[#allocation5 + $0x310] sm:$0xff]  ;;  %v804_v14 = vpack.c.bf16 %v137_v7, %v133_v6  ;;  %v878_v15 = vpack.c.bf16 %v164_v8, %v160_v4  ;;  %v168_v16 = vld [vmem:[#allocation5 + $0x358] sm:$0xff] }
  0x56   :  { %795 = vmatprep.subr.bf16.mxu0 %v794_v42  ;;  %v163_v13 = vld [vmem:[#allocation5 + $0x330] sm:$0xff]  ;;  %v806_v17 = vpack.c.bf16 %v146_v10, %v142_v9  ;;  %v141_v18 = vld [vmem:[#allocation5 + $0x280] sm:$0xff]  ;;  %v172_v21 = vld [vmem:[#allocation5 + $0x378] sm:$0xff] }
  0x57   :  { %861 = vmatpush1.bf16.msra.mxu1 %v860_v23  ;;  %v145_v20 = vld [vmem:[#allocation5 + $0x2a0] sm:$0xff]  ;;  %v150_v22 = vld [vmem:[#allocation5 + $0x2c8] sm:$0xff]  ;;  %v880_v24 = vpack.c.bf16 %v163_v13, %v159_v12  ;;  %v167_v25 = vld [vmem:[#allocation5 + $0x350] sm:$0xff]  ;;  %v882_v28 = vpack.c.bf16 %v172_v21, %v168_v16  ;;  %v1237_v13 = vrot.slane %v1224_v53, %v1233_v0 }
  0x58   :  { %863 = vmatprep.subr.bf16.mxu1 %v862_v27  ;;  %v154_v23 = vld [vmem:[#allocation5 + $0x2e8] sm:$0xff]  ;;  %v171_v26 = vld [vmem:[#allocation5 + $0x370] sm:$0xff]  ;;  %v808_v27 = vpack.c.bf16 %v145_v20, %v141_v18  ;;  %v176_v29 = vld [vmem:[#allocation5 + $0x398] sm:$0xff] }
  0x59   :  { %797 = vmatpush1.bf16.msra.mxu0 %v796_v52  ;;  %v810_v30 = vpack.c.bf16 %v154_v23, %v150_v22  ;;  %v149_v31 = vld [vmem:[#allocation5 + $0x2c0] sm:$0xff]  ;;  %v180_v34 = vld [vmem:[#allocation5 + $0x3b8] sm:$0xff]  ;;  %v158_v35 = vld [vmem:[#allocation5 + $0x308] sm:$0xff]  ;;  %v884_v37 = vpack.c.bf16 %v171_v26, %v167_v25 }
  0x5a   :  { %799 = vmatprep.subr.bf16.mxu0 %v798_v56  ;;  %v153_v33 = vld [vmem:[#allocation5 + $0x2e0] sm:$0xff]  ;;  %v175_v38 = vld [vmem:[#allocation5 + $0x390] sm:$0xff]  ;;  %v886_v41 = vpack.c.bf16 %v180_v34, %v176_v29  ;;  %v184_v42 = vld [vmem:[#allocation5 + $0x3d8] sm:$0xff] }
  0x5b   :  { %865 = vmatpush1.bf16.msra.mxu1 %v864_v36  ;;  %v162_v36 = vld [vmem:[#allocation5 + $0x328] sm:$0xff]  ;;  %v179_v39 = vld [vmem:[#allocation5 + $0x3b0] sm:$0xff]  ;;  %v157_v44 = vld [vmem:[#allocation5 + $0x300] sm:$0xff] }
  0x5c   :  { %867 = vmatprep.subr.bf16.mxu1 %v866_v40  ;;  %v812_v40 = vpack.c.bf16 %v153_v33, %v149_v31  ;;  %v814_v43 = vpack.c.bf16 %v162_v36, %v158_v35  ;;  %v161_v46 = vld [vmem:[#allocation5 + $0x320] sm:$0xff]  ;;  %v188_v47 = vld [vmem:[#allocation5 + $0x3f8] sm:$0xff]  ;;  %v166_v48 = vld [vmem:[#allocation5 + $0x348] sm:$0xff]  ;;  %v888_v50 = vpack.c.bf16 %v179_v39, %v175_v38 }
  0x5d   :  { %801 = vmatpush1.bf16.msra.mxu0 %v800_v2  ;;  %v183_v51 = vld [vmem:[#allocation5 + $0x3d0] sm:$0xff]  ;;  %v890_v55 = vpack.c.bf16 %v188_v47, %v184_v42  ;;  %v165_v57 = vld [vmem:[#allocation5 + $0x340] sm:$0xff]  ;;  %v174_v60 = vld [vmem:[#allocation5 + $0x388] sm:$0xff] }
  0x5e   :  { %803 = vmatprep.subr.bf16.mxu0 %v802_v5  ;;  %v187_v52 = vld [vmem:[#allocation5 + $0x3f0] sm:$0xff]  ;;  %v169_v58 = vld [vmem:[#allocation5 + $0x360] sm:$0xff]  ;;  %v178_v61 = vld [vmem:[#allocation5 + $0x3a8] sm:$0xff] }
  0x5f   :  { %869 = vmatpush1.bf16.msra.mxu1 %v868_v49  ;;  %v170_v49 = vld [vmem:[#allocation5 + $0x368] sm:$0xff]  ;;  %v404_v62 = vld [vmem:[#allocation7 + $0x18] sm:$0xff]  ;;  %v892_v1 = vpack.c.bf16 %v187_v52, %v183_v51  ;;  %v820_v2 = vpack.c.bf16 %v169_v58, %v165_v57  ;;  %v177_v4 = vld [vmem:[#allocation5 + $0x3a0] sm:$0xff]  ;;  %v822_v5 = vpack.c.bf16 %v178_v61, %v174_v60 }
  0x60   :  { %871 = vmatprep.subr.bf16.mxu1 %v870_v54  ;;  %v816_v54 = vpack.c.bf16 %v161_v46, %v157_v44  ;;  %v818_v56 = vpack.c.bf16 %v170_v49, %v166_v48  ;;  %v182_v6 = vld [vmem:[#allocation5 + $0x3c8] sm:$0xff]  ;;  %v403_v8 = vld [vmem:[#allocation7 + $0x10] sm:$0xff]  ;;  %v416_v12 = vld [vmem:[#allocation7 + $0x78] sm:$0xff] }
  0x61   :  { %805 = vmatpush1.bf16.msra.mxu0 %v804_v14  ;;  %v407_v9 = vld [vmem:[#allocation7 + $0x30] sm:$0xff]  ;;  %v186_v10 = vld [vmem:[#allocation5 + $0x3e8] sm:$0xff]  ;;  %v185_v16 = vld [vmem:[#allocation5 + $0x3e0] sm:$0xff] }
  0x62   :  { %807 = vmatprep.subr.bf16.mxu0 %v806_v17  ;;  %v960_v17 = vpack.c.bf16 %v407_v9, %v403_v8  ;;  %v826_v18 = vpack.c.bf16 %v186_v10, %v182_v6  ;;  %v402_v20 = vld [vmem:[#allocation7 + $0x8] sm:$0xff]  ;;  %v411_v22 = vld [vmem:[#allocation7 + $0x50] sm:$0xff]  ;;  %v420_v25 = vld [vmem:[#allocation7 + $0x98] sm:$0xff] }
  0x63   :  { %873 = vmatpush1.bf16.msra.mxu1 %v872_v63  ;;  %v408_v63 = vld [vmem:[#allocation7 + $0x38] sm:$0xff]  ;;  %v415_v23 = vld [vmem:[#allocation7 + $0x70] sm:$0xff]  ;;  %v405_v29 = vld [vmem:[#allocation7 + $0x20] sm:$0xff] }
  0x64   :  { %875 = vmatprep.subr.bf16.mxu1 %v874_v3  ;;  %v173_v3 = vld [vmem:[#allocation5 + $0x380] sm:$0xff]  ;;  %v958_v7 = vpack.c.bf16 %v408_v63, %v404_v62  ;;  %v424_v26 = vld [vmem:[#allocation7 + $0xb8] sm:$0xff]  ;;  %v410_v33 = vld [vmem:[#allocation7 + $0x48] sm:$0xff] }
  0x65   :  { %809 = vmatpush1.bf16.msra.mxu0 %v808_v27  ;;  %v824_v14 = vpack.c.bf16 %v177_v4, %v173_v3  ;;  %v966_v34 = vpack.c.bf16 %v424_v26, %v420_v25  ;;  %v419_v35 = vld [vmem:[#allocation7 + $0x90] sm:$0xff]  ;;  %v428_v38 = vld [vmem:[#allocation7 + $0xd8] sm:$0xff]  ;;  %v413_v42 = vld [vmem:[#allocation7 + $0x60] sm:$0xff] }
  0x66   :  { %811 = vmatprep.subr.bf16.mxu0 %v810_v30  ;;  %v964_v30 = vpack.c.bf16 %v415_v23, %v411_v22  ;;  %v423_v36 = vld [vmem:[#allocation7 + $0xb0] sm:$0xff]  ;;  %v432_v39 = vld [vmem:[#allocation7 + $0xf8] sm:$0xff]  ;;  %v418_v46 = vld [vmem:[#allocation7 + $0x88] sm:$0xff] }
  0x67   :  { %877 = vmatpush1.bf16.msra.mxu1 %v876_v11  ;;  %v412_v11 = vld [vmem:[#allocation7 + $0x58] sm:$0xff]  ;;  %v970_v47 = vpack.c.bf16 %v432_v39, %v428_v38  ;;  %v427_v48 = vld [vmem:[#allocation7 + $0xd0] sm:$0xff]  ;;  %v426_v60 = vld [vmem:[#allocation7 + $0xc8] sm:$0xff] }
  0x68   :  { %879 = vmatprep.subr.bf16.mxu1 %v878_v15  ;;  %v181_v15 = vld [vmem:[#allocation5 + $0x3c0] sm:$0xff]  ;;  %v962_v21 = vpack.c.bf16 %v416_v12, %v412_v11  ;;  %v431_v49 = vld [vmem:[#allocation7 + $0xf0] sm:$0xff]  ;;  %v436_v51 = vld [vmem:[#allocation7 + $0x118] sm:$0xff] }
  0x69   :  { %813 = vmatpush1.bf16.msra.mxu0 %v812_v40  ;;  %v828_v27 = vpack.c.bf16 %v185_v16, %v181_v15  ;;  %v440_v52 = vld [vmem:[#allocation7 + $0x138] sm:$0xff]  ;;  %v972_v57 = vpack.c.bf16 %v431_v49, %v427_v48  ;;  %v435_v62 = vld [vmem:[#allocation7 + $0x110] sm:$0xff]  ;;  %v429_v8 = vld [vmem:[#allocation7 + $0xe0] sm:$0xff] }
  0x6a   :  { %815 = vmatprep.subr.bf16.mxu0 %v814_v43  ;;  %v968_v43 = vpack.c.bf16 %v423_v36, %v419_v35  ;;  %v974_v61 = vpack.c.bf16 %v440_v52, %v436_v51  ;;  %v439_v63 = vld [vmem:[#allocation7 + $0x130] sm:$0xff]  ;;  %v448_v3 = vld [vmem:[#allocation7 + $0x178] sm:$0xff]  ;;  %v434_v10 = vld [vmem:[#allocation7 + $0x108] sm:$0xff] }
  0x6b   :  { %881 = vmatpush1.bf16.msra.mxu1 %v880_v24  ;;  %v406_v24 = vld [vmem:[#allocation7 + $0x28] sm:$0xff]  ;;  %v433_v15 = vld [vmem:[#allocation7 + $0x100] sm:$0xff]  ;;  %v447_v26 = vld [vmem:[#allocation7 + $0x170] sm:$0xff] }
  0x6c   :  { %883 = vmatprep.subr.bf16.mxu1 %v882_v28  ;;  %v401_v28 = vld [vmem:[#allocation7] sm:$0xff]  ;;  %v894_v31 = vpack.c.bf16 %v406_v24, %v402_v20  ;;  %v438_v11 = vld [vmem:[#allocation7 + $0x128] sm:$0xff]  ;;  %v443_v24 = vld [vmem:[#allocation7 + $0x150] sm:$0xff] }
  0x6d   :  { %817 = vmatpush1.bf16.msra.mxu0 %v816_v54  ;;  %v896_v40 = vpack.c.bf16 %v405_v29, %v401_v28  ;;  %v437_v16 = vld [vmem:[#allocation7 + $0x120] sm:$0xff]  ;;  %v450_v28 = vld [vmem:[#allocation7 + $0x188] sm:$0xff]  ;;  %v451_v38 = vld [vmem:[#allocation7 + $0x190] sm:$0xff] }
  0x6e   :  { %819 = vmatprep.subr.bf16.mxu0 %v818_v56  ;;  %v421_v56 = vld [vmem:[#allocation7 + $0xa0] sm:$0xff]  ;;  %v912_v20 = vpack.c.bf16 %v437_v16, %v433_v15  ;;  %v454_v29 = vld [vmem:[#allocation7 + $0x1a8] sm:$0xff]  ;;  %v455_v39 = vld [vmem:[#allocation7 + $0x1b0] sm:$0xff] }
  0x6f   :  { %885 = vmatpush1.bf16.msra.mxu1 %v884_v37  ;;  %v414_v37 = vld [vmem:[#allocation7 + $0x68] sm:$0xff]  ;;  %v441_v22 = vld [vmem:[#allocation7 + $0x140] sm:$0xff]  ;;  %v459_v51 = vld [vmem:[#allocation7 + $0x1d0] sm:$0xff] }
  0x70   :  { %887 = vmatprep.subr.bf16.mxu1 %v886_v41  ;;  %v409_v41 = vld [vmem:[#allocation7 + $0x40] sm:$0xff]  ;;  %v898_v44 = vpack.c.bf16 %v414_v37, %v410_v33  ;;  %v456_v33 = vld [vmem:[#allocation7 + $0x1b8] sm:$0xff]  ;;  %v463_v52 = vld [vmem:[#allocation7 + $0x1f0] sm:$0xff] }
  0x71   :  { %821 = vmatpush1.bf16.msra.mxu0 %v820_v2  ;;  %v900_v54 = vpack.c.bf16 %v413_v42, %v409_v41  ;;  %v444_v2 = vld [vmem:[#allocation7 + $0x158] sm:$0xff]  ;;  %v445_v23 = vld [vmem:[#allocation7 + $0x160] sm:$0xff]  ;;  %v458_v41 = vld [vmem:[#allocation7 + $0x1c8] sm:$0xff] }
  0x72   :  { %823 = vmatprep.subr.bf16.mxu0 %v822_v5  ;;  %v976_v5 = vpack.c.bf16 %v439_v63, %v435_v62  ;;  %v978_v9 = vpack.c.bf16 %v448_v3, %v444_v2  ;;  %v916_v25 = vpack.c.bf16 %v445_v23, %v441_v22  ;;  %v453_v35 = vld [vmem:[#allocation7 + $0x1a0] sm:$0xff]  ;;  %v462_v42 = vld [vmem:[#allocation7 + $0x1e8] sm:$0xff]  ;;  %v467_v2 = vld [vmem:[#allocation7 + $0x210] sm:$0xff] }
  0x73   :  { %889 = vmatpush1.bf16.msra.mxu1 %v888_v50  ;;  %v422_v50 = vld [vmem:[#allocation7 + $0xa8] sm:$0xff]  ;;  %v461_v48 = vld [vmem:[#allocation7 + $0x1e0] sm:$0xff]  ;;  %v471_v3 = vld [vmem:[#allocation7 + $0x230] sm:$0xff] }
  0x74   :  { %891 = vmatprep.subr.bf16.mxu1 %v890_v55  ;;  %v417_v55 = vld [vmem:[#allocation7 + $0x80] sm:$0xff]  ;;  %v902_v58 = vpack.c.bf16 %v422_v50, %v418_v46  ;;  %v464_v46 = vld [vmem:[#allocation7 + $0x1f8] sm:$0xff]  ;;  %v475_v15 = vld [vmem:[#allocation7 + $0x250] sm:$0xff] }
  0x75   :  { %825 = vmatpush1.bf16.msra.mxu0 %v824_v14  ;;  %v904_v4 = vpack.c.bf16 %v421_v56, %v417_v55  ;;  %v910_v14 = vpack.c.bf16 %v438_v11, %v434_v10  ;;  %v466_v55 = vld [vmem:[#allocation7 + $0x208] sm:$0xff]  ;;  %v469_v62 = vld [vmem:[#allocation7 + $0x220] sm:$0xff]  ;;  %v479_v16 = vld [vmem:[#allocation7 + $0x270] sm:$0xff] }
  0x76   :  { %827 = vmatprep.subr.bf16.mxu0 %v826_v18  ;;  %v446_v18 = vld [vmem:[#allocation7 + $0x168] sm:$0xff]  ;;  %v473_v10 = vld [vmem:[#allocation7 + $0x240] sm:$0xff]  ;;  %v488_v23 = vld [vmem:[#allocation7 + $0x2b8] sm:$0xff] }
  0x77   :  { %893 = vmatpush1.bf16.msra.mxu1 %v892_v1  ;;  %v430_v1 = vld [vmem:[#allocation7 + $0xe8] sm:$0xff]  ;;  %v477_v11 = vld [vmem:[#allocation7 + $0x260] sm:$0xff] }
  0x78   :  { %959 = vmatprep.subr.bf16.mxu1 %v958_v7  ;;  %v906_v6 = vpack.c.bf16 %v430_v1, %v426_v60  ;;  %v425_v7 = vld [vmem:[#allocation7 + $0xc0] sm:$0xff]  ;;  %v470_v56 = vld [vmem:[#allocation7 + $0x228] sm:$0xff]  ;;  %v472_v60 = vld [vmem:[#allocation7 + $0x238] sm:$0xff] }
  0x79   :  { %829 = vmatpush1.bf16.msra.mxu0 %v828_v27  ;;  %v908_v12 = vpack.c.bf16 %v429_v8, %v425_v7  ;;  %v980_v27 = vpack.c.bf16 %v447_v26, %v443_v24  ;;  %v476_v7 = vld [vmem:[#allocation7 + $0x258] sm:$0xff]  ;;  %v481_v24 = vld [vmem:[#allocation7 + $0x280] sm:$0xff] }
  0x7a   :  { %358 = vmatmul.mubr.f32.vlgmr.msra.gmra.mrb[0].mxu1 %v1237_v13  ;;  %895 = vmatprep.subr.bf16.mxu0 %v894_v31  ;;  %v918_v31 = vpack.c.bf16 %v454_v29, %v450_v28  ;;  %v483_v28 = vld [vmem:[#allocation7 + $0x290] sm:$0xff] }
  0x7b   :  { %961 = vmatpush1.bf16.msra.mxu1 %v960_v17  ;;  %v442_v17 = vld [vmem:[#allocation7 + $0x148] sm:$0xff]  ;;  %v487_v29 = vld [vmem:[#allocation7 + $0x2b0] sm:$0xff] }
  0x7c   :  { %963 = vmatprep.subr.bf16.mxu1 %v962_v21  ;;  %287 = vmatmul.mubr.f32.vlgmr.msra.gmra.mrb[0].mxu0 %v1237_v13  ;;  %v914_v21 = vpack.c.bf16 %v446_v18, %v442_v17  ;;  %v996_v17 = vpack.c.bf16 %v479_v16, %v475_v15  ;;  %v482_v18 = vld [vmem:[#allocation7 + $0x288] sm:$0xff]  ;;  %v517_v15 = vld [vmem:[#allocation7 + $0x3a0] sm:$0xff] }
  0x7d   :  { %897 = vmatpush1.bf16.msra.mxu0 %v896_v40  ;;  %v984_v40 = vpack.c.bf16 %v455_v39, %v451_v38  ;;  %v493_v38 = vld [vmem:[#allocation7 + $0x2e0] sm:$0xff] }
  0x7e   :  { %899 = vmatprep.subr.bf16.mxu0 %v898_v44  ;;  %v922_v44 = vpack.c.bf16 %v462_v42, %v458_v41  ;;  %v491_v41 = vld [vmem:[#allocation7 + $0x2d0] sm:$0xff] }
  0x7f   :  { %965 = vmatpush1.bf16.msra.mxu1 %v964_v30  ;;  %v452_v30 = vld [vmem:[#allocation7 + $0x198] sm:$0xff]  ;;  %v495_v42 = vld [vmem:[#allocation7 + $0x2f0] sm:$0xff] }
  0x80   :  { %967 = vmatprep.subr.bf16.mxu1 %v966_v34  ;;  %v449_v34 = vld [vmem:[#allocation7 + $0x180] sm:$0xff]  ;;  %v982_v36 = vpack.c.bf16 %v456_v33, %v452_v30  ;;  %v1000_v30 = vpack.c.bf16 %v487_v29, %v483_v28  ;;  %v494_v33 = vld [vmem:[#allocation7 + $0x2e8] sm:$0xff] }
  0x81   :  { %901 = vmatpush1.bf16.msra.mxu0 %v900_v54  ;;  %v920_v37 = vpack.c.bf16 %v453_v35, %v449_v34  ;;  %v988_v54 = vpack.c.bf16 %v463_v52, %v459_v51  ;;  %v492_v34 = vld [vmem:[#allocation7 + $0x2d8] sm:$0xff]  ;;  %v501_v51 = vld [vmem:[#allocation7 + $0x320] sm:$0xff] }
  0x82   :  { %903 = vmatprep.subr.bf16.mxu0 %v902_v58  ;;  %v926_v58 = vpack.c.bf16 %v470_v56, %v466_v55  ;;  %v499_v55 = vld [vmem:[#allocation7 + $0x310] sm:$0xff]  ;;  %v521_v28 = vld [vmem:[#allocation7 + $0x3c0] sm:$0xff] }
  0x83   :  { %969 = vmatpush1.bf16.msra.mxu1 %v968_v43  ;;  %v460_v43 = vld [vmem:[#allocation7 + $0x1d8] sm:$0xff]  ;;  %v503_v56 = vld [vmem:[#allocation7 + $0x330] sm:$0xff]  ;;  %v525_v29 = vld [vmem:[#allocation7 + $0x3e0] sm:$0xff] }
  0x84   :  { %971 = vmatprep.subr.bf16.mxu1 %v970_v47  ;;  %v457_v47 = vld [vmem:[#allocation7 + $0x1c0] sm:$0xff]  ;;  %v986_v49 = vpack.c.bf16 %v464_v46, %v460_v43  ;;  %v1004_v43 = vpack.c.bf16 %v495_v42, %v491_v41  ;;  %v502_v46 = vld [vmem:[#allocation7 + $0x328] sm:$0xff] }
  0x85   :  { %905 = vmatpush1.bf16.msra.mxu0 %v904_v4  ;;  %v924_v50 = vpack.c.bf16 %v461_v48, %v457_v47  ;;  %v992_v4 = vpack.c.bf16 %v471_v3, %v467_v2  ;;  %v500_v47 = vld [vmem:[#allocation7 + $0x318] sm:$0xff]  ;;  %v509_v2 = vld [vmem:[#allocation7 + $0x360] sm:$0xff] }
  0x86   :  { %907 = vmatprep.subr.bf16.mxu0 %v906_v6  ;;  %v478_v6 = vld [vmem:[#allocation7 + $0x268] sm:$0xff] }
  0x87   :  { %973 = vmatpush1.bf16.msra.mxu1 %v972_v57  ;;  %v468_v57 = vld [vmem:[#allocation7 + $0x218] sm:$0xff] }
  0x88   :  { %975 = vmatprep.subr.bf16.mxu1 %v974_v61  ;;  %v465_v61 = vld [vmem:[#allocation7 + $0x200] sm:$0xff]  ;;  %v990_v63 = vpack.c.bf16 %v472_v60, %v468_v57  ;;  %v1008_v57 = vpack.c.bf16 %v503_v56, %v499_v55  ;;  %v510_v60 = vld [vmem:[#allocation7 + $0x368] sm:$0xff] }
  0x89   :  { %909 = vmatpush1.bf16.msra.mxu0 %v908_v12  ;;  %v928_v1 = vpack.c.bf16 %v469_v62, %v465_v61  ;;  %v508_v61 = vld [vmem:[#allocation7 + $0x358] sm:$0xff] }
  0x8a   :  { %911 = vmatprep.subr.bf16.mxu0 %v910_v14  ;;  %v932_v14 = vpack.c.bf16 %v477_v11, %v473_v10  ;;  %v516_v10 = vld [vmem:[#allocation7 + $0x398] sm:$0xff] }
  0x8b   :  { %977 = vmatpush1.bf16.msra.mxu1 %v976_v5  ;;  %v474_v5 = vld [vmem:[#allocation7 + $0x248] sm:$0xff] }
  0x8c   :  { %979 = vmatprep.subr.bf16.mxu1 %v978_v9  ;;  %v930_v8 = vpack.c.bf16 %v478_v6, %v474_v5  ;;  %v480_v9 = vld [vmem:[#allocation7 + $0x278] sm:$0xff]  ;;  %v507_v5 = vld [vmem:[#allocation7 + $0x350] sm:$0xff] }
  0x8d   :  { %913 = vmatpush1.bf16.msra.mxu0 %v912_v20  ;;  %v994_v12 = vpack.c.bf16 %v480_v9, %v476_v7  ;;  %v486_v20 = vld [vmem:[#allocation7 + $0x2a8] sm:$0xff]  ;;  %v511_v6 = vld [vmem:[#allocation7 + $0x370] sm:$0xff] }
  0x8e   :  { %915 = vmatprep.subr.bf16.mxu0 %v914_v21  ;;  %v484_v21 = vld [vmem:[#allocation7 + $0x298] sm:$0xff]  ;;  %v934_v22 = vpack.c.bf16 %v486_v20, %v482_v18  ;;  %v1012_v7 = vpack.c.bf16 %v511_v6, %v507_v5  ;;  %v518_v9 = vld [vmem:[#allocation7 + $0x3a8] sm:$0xff]  ;;  %v515_v18 = vld [vmem:[#allocation7 + $0x390] sm:$0xff] }
  0x8f   :  { %981 = vmatpush1.bf16.msra.mxu1 %v980_v27  ;;  %v998_v26 = vpack.c.bf16 %v488_v23, %v484_v21  ;;  %v519_v20 = vld [vmem:[#allocation7 + $0x3b0] sm:$0xff]  ;;  %v522_v21 = vld [vmem:[#allocation7 + $0x3c8] sm:$0xff] }
  0x90   :  { %983 = vmatprep.subr.bf16.mxu1 %v982_v36  ;;  %v496_v36 = vld [vmem:[#allocation7 + $0x2f8] sm:$0xff]  ;;  %v526_v23 = vld [vmem:[#allocation7 + $0x3e8] sm:$0xff] }
  0x91   :  { %917 = vmatpush1.bf16.msra.mxu0 %v916_v25  ;;  %v485_v25 = vld [vmem:[#allocation7 + $0x2a0] sm:$0xff]  ;;  %v1002_v39 = vpack.c.bf16 %v496_v36, %v492_v34  ;;  %v189_v36 = vld [vmem:[%s1274_s2] sm:$0xf] }
  0x92   :  { %919 = vmatprep.subr.bf16.mxu0 %v918_v31  ;;  %v936_v27 = vpack.c.bf16 %v485_v25, %v481_v24  ;;  %v490_v31 = vld [vmem:[#allocation7 + $0x2c8] sm:$0xff]  ;;  %v524_v24 = vld [vmem:[#allocation7 + $0x3d8] sm:$0xff] }
  0x93   :  { %985 = vmatpush1.bf16.msra.mxu1 %v984_v40  ;;  %v938_v35 = vpack.c.bf16 %v494_v33, %v490_v31  ;;  %v528_v25 = vld [vmem:[#allocation7 + $0x3f8] sm:$0xff]  ;;  %v956_v31 = vpack.c.bf16 %v525_v29, %v521_v28  ;;  %v527_v33 = vld [vmem:[#allocation7 + $0x3f0] sm:$0xff] }
  0x94   :  { %987 = vmatprep.subr.bf16.mxu1 %v986_v49  ;;  %v504_v49 = vld [vmem:[#allocation7 + $0x338] sm:$0xff] }
  0x95   :  { %921 = vmatpush1.bf16.msra.mxu0 %v920_v37  ;;  %v489_v37 = vld [vmem:[#allocation7 + $0x2c0] sm:$0xff]  ;;  %v1006_v52 = vpack.c.bf16 %v504_v49, %v500_v47  ;;  %v205_v49 = vrot.slane %v189_v36, %v1233_v0 }
  0x96   :  { %923 = vmatprep.subr.bf16.mxu0 %v922_v44  ;;  %v940_v40 = vpack.c.bf16 %v493_v38, %v489_v37  ;;  %v498_v44 = vld [vmem:[#allocation7 + $0x308] sm:$0xff]  ;;  %v216_v37 = vsub.s32 3, %v1219_v32 }
  0x97   :  { %989 = vmatpush1.bf16.msra.mxu1 %v988_v54  ;;  %v942_v48 = vpack.c.bf16 %v502_v46, %v498_v44 }
  0x98   :  { %991 = vmatprep.subr.bf16.mxu1 %v990_v63  ;;  %v512_v63 = vld [vmem:[#allocation7 + $0x378] sm:$0xff] }
  0x99   :  { %925 = vmatpush1.bf16.msra.mxu0 %v924_v50  ;;  %v497_v50 = vld [vmem:[#allocation7 + $0x300] sm:$0xff]  ;;  %v1010_v3 = vpack.c.bf16 %v512_v63, %v508_v61  ;;  %v1144_v61 = vmov 1966171168  }
  0x9a   :  { %927 = vmatprep.subr.bf16.mxu0 %v926_v58  ;;  %v944_v54 = vpack.c.bf16 %v501_v51, %v497_v50  ;;  %v506_v58 = vld [vmem:[#allocation7 + $0x348] sm:$0xff]  ;;  %v209_v50 = vrot.slane %v189_v36, %v1222_v45 }
  0x9b   :  { %993 = vmatpush1.bf16.msra.mxu1 %v992_v4  ;;  %v946_v62 = vpack.c.bf16 %v510_v60, %v506_v58 }
  0x9c   :  { %995 = vmatprep.subr.bf16.mxu1 %v994_v12  ;;  %v520_v12 = vld [vmem:[#allocation7 + $0x3b8] sm:$0xff] }
  0x9d   :  { %929 = vmatpush1.bf16.msra.mxu0 %v928_v1  ;;  %v505_v1 = vld [vmem:[#allocation7 + $0x340] sm:$0xff]  ;;  %v1014_v16 = vpack.c.bf16 %v520_v12, %v516_v10 }
  0x9e   :  { %931 = vmatprep.subr.bf16.mxu0 %v930_v8  ;;  %v948_v4 = vpack.c.bf16 %v509_v2, %v505_v1  ;;  %v514_v8 = vld [vmem:[#allocation7 + $0x388] sm:$0xff] }
  0x9f   :  { %997 = vmatpush1.bf16.msra.mxu1 %v996_v17  ;;  %v950_v11 = vpack.c.bf16 %v518_v9, %v514_v8 }
  0xa0   :  { %999 = vmatprep.subr.bf16.mxu1 %v998_v26  ;;  %v954_v26 = vpack.c.bf16 %v526_v23, %v522_v21 }
  0xa1   :  { %933 = vmatpush1.bf16.msra.mxu0 %v932_v14  ;;  %v513_v14 = vld [vmem:[#allocation7 + $0x380] sm:$0xff] }
  0xa2   :  { %935 = vmatprep.subr.bf16.mxu0 %v934_v22  ;;  %v952_v17 = vpack.c.bf16 %v517_v15, %v513_v14  ;;  %v1016_v22 = vpack.c.bf16 %v519_v20, %v515_v18 }
  0xa3   :  { %1001 = vmatpush1.bf16.msra.mxu1 %v1000_v30  ;;  %v523_v30 = vld [vmem:[#allocation7 + $0x3d0] sm:$0xff] }
  0xa4   :  { %1003 = vmatprep.subr.bf16.mxu1 %v1002_v39  ;;  %v1020_v34 = vpack.c.bf16 %v527_v33, %v523_v30  ;;  %v217_v39 = vrot.slane %v189_v36, %v216_v37 }
  0xa5   :  { %937 = vmatpush1.bf16.msra.mxu0 %v936_v27  ;;  %v1018_v27 = vpack.c.bf16 %v528_v25, %v524_v24 }
  0xa6   :  { %939 = vmatprep.subr.bf16.mxu0 %v938_v35  ;;  %v212_v35 = vsub.s32 2, %v1219_v32 }
  0xa7   :  { %1005 = vmatpush1.bf16.msra.mxu1 %v1004_v43 }
  0xa8   :  { %1007 = vmatprep.subr.bf16.mxu1 %v1006_v52  ;;  %v213_v38 = vrot.slane %v189_v36, %v212_v35 }
  0xa9   :  { %941 = vmatpush1.bf16.msra.mxu0 %v940_v40 }
  0xaa   :  { %943 = vmatprep.subr.bf16.mxu0 %v942_v48 }
  0xab   :  { %1009 = vmatpush1.bf16.msra.mxu1 %v1008_v57 }
  0xac   :  { %1011 = vmatprep.subr.bf16.mxu1 %v1010_v3 }
  0xad   :  { %945 = vmatpush1.bf16.msra.mxu0 %v944_v54 }
  0xae   :  { %947 = vmatprep.subr.bf16.mxu0 %v946_v62  ;;  %v386_v62 = vunpack.c.l.s4 %v1144_v61 }
  0xaf   :  { %1013 = vmatpush1.bf16.msra.mxu1 %v1012_v7 }
  0xb0   :  { %1015 = vmatprep.subr.bf16.mxu1 %v1014_v16  ;;  %v387_v2 = vunpack.c.0.s8 %v386_v62 }
  0xb1   :  { %949 = vmatpush1.bf16.msra.mxu0 %v948_v4 }
  0xb2   :  { %951 = vmatprep.subr.bf16.mxu0 %v950_v11  ;;  %v390_v7 = vsub.s32 %v387_v2, %v1219_v32 }
  0xb3   :  { %1017 = vmatpush1.bf16.msra.mxu1 %v1016_v22 }
  0xb4   :  { %1019 = vmatprep.subr.bf16.mxu1 %v1018_v27 }
  0xb5   :  { %953 = vmatpush1.bf16.msra.mxu0 %v952_v17 }
  0xb6   :  { %955 = vmatprep.subr.bf16.mxu0 %v954_v26 }
  0xb7   :  { %1021 = vmatpush1.bf16.msra.mxu1 %v1020_v34 }
  0xb9   :  { %957 = vmatpush1.bf16.msra.mxu0 %v956_v31 }
 0x14d   :  { %v359_v40 = vpop.f32.mrb[0].mxu1 }
 0x14e   :  { %v360_v41 = vadd.f32 %v359_v40, %v213_v38  ;;  %v361_v42 = vpop.f32.mrb[1].mxu1 }
 0x14f   :  { %v362_v43 = vadd.f32 %v361_v42, %v217_v39  ;;  %v288_v47 = vpop.f32.mrb[0].mxu0 }
 0x150   :  { %v762_v44 = vmul.f32 -1.442695, %v360_v41  ;;  %v290_v48 = vpop.f32.mrb[1].mxu0  ;;  %v289_v56 = vadd.f32 %v288_v47, %v205_v49 }
 0x151   :  { %v763_v46 = vmul.f32 -1.442695, %v362_v43  ;;  %v291_v57 = vadd.f32 %v290_v48, %v209_v50 }
 0x152   :  { %1029 = vpow2.f32 %v762_v44  ;;  %v364_v58 = vmax.f32 %v289_v56, 0.0 }
 0x153   :  { %1031 = vpow2.f32 %v763_v46  ;;  %v365_v60 = vmax.f32 %v291_v57, 0.0 }
 0x154   :  { %v378_v63 = vsub.f32 %v364_v58, %v1237_v13 }
 0x155   :  { %v379_v1 = vsub.f32 %v365_v60, %v1228_v59  ;;  %v529_v59 = vld [vmem:[%s1276_s4] sm:$0xf]  ;;  %s1145_s4 = smov [#allocation8]  }
 0x156   :  { %v553_v13 = vrot.slane %v529_v59, %v212_v35  ;;  %v557_v15 = vrot.slane %v529_v59, %v216_v37  ;;  %v545_v24 = vrot.slane %v529_v59, %v1233_v0  ;;  %v549_v27 = vrot.slane %v529_v59, %v1222_v45  ;;  %s752_s6 = sshll.u32 %s1145_s4, 4  ;;  %s753_s6 = int_to_ptr.vmem [resolvable:$true] %s752_s6 }
 0x157   :  { %s1111_s7 = scalar_lea.vmem %s753_s6, 32  ;;  %p1116_p11 = scmp.lt.s32.totalorder %s753_s6, %s753_s6 }
 0x158   :  { %p1112_p10 = scmp.ne.s32.totalorder %s753_s6, %s1111_s7  ;;  %p1117_p12 = scmp.lt.s32.totalorder %s1111_s7, %s1111_s7 }
 0x15a   :  { %p1118_p13 = por %p1117_p12, %p1116_p11 }
 0x15c   :  { %v1030_v51 = vpop.eup %1029  ;;  %p1119_p0 = pnand %p1118_p13, %p1112_p10 }
 0x15d   :  { %v1032_v52 = vpop.eup %1031  ;;  %v372_v54 = vadd.f32 1.0, %v1030_v51 }
 0x15e   :  { %v373_v55 = vadd.f32 1.0, %v1032_v52 }
 0x15f   :  { %1033 = vrcp.f32 %v372_v54 }
 0x160   :  { %1035 = vrcp.f32 %v373_v55 }
 0x169   :  { %v1034_v3 = vpop.eup %1033 }
 0x16a   :  { %v1036_v4 = vpop.eup %1035  ;;  %v380_v5 = vmul.f32 %v1034_v3, %v378_v63 }
 0x16b   :  { %v381_v6 = vmul.f32 %v1036_v4, %v379_v1 }
 0x16d   :  { %v384_v8 = vcombine.low %v380_v5, %v381_v6 }
 0x16f   :  { %v391_v9 = vrot.slane %v384_v8, %v390_v7 }
 0x171   :  { %v398_v10 = vrot.slane %v391_v9, %v390_v7 }
 0x173   :  { %v400_v11 = vadd.f32 %v398_v10, %v1224_v53 }
 0x175   :  { %v538_v12 = vrot.slane %v400_v11, %v1222_v45  ;;  %v534_v14 = vrot.slane %v400_v11, %v1233_v0 }
 0x177   :  { %626 = vmatprep.mubr.f32.mxu0 %v538_v12  ;;  %697 = vmatprep.mubr.f32.mxu1 %v538_v12 }
 0x178   :  { %627 = vmatmul.mubr.f32.vlgmr.msra.gmra.mrb[2].mxu0 %v534_v14  ;;  %698 = vmatmul.mubr.f32.vlgmr.msra.gmra.mrb[2].mxu1 %v534_v14 }
 0x24b   :  { %v628_v32 = vpop.f32.mrb[2].mxu0  ;;  %v699_v16 = vpop.f32.mrb[2].mxu1 }
 0x24c   :  { %v700_v17 = vadd.f32 %v699_v16, %v553_v13  ;;  %v630_v18 = vpop.f32.mrb[3].mxu0  ;;  %v701_v20 = vpop.f32.mrb[3].mxu1  ;;  %v629_v29 = vadd.f32 %v628_v32, %v545_v24 }
 0x24d   :  { %v702_v53 = vadd.f32 %v701_v20, %v557_v15  ;;  %v631_v30 = vadd.f32 %v630_v18, %v549_v27 }
 0x24e   :  { %v764_v21 = vmul.f32 -1.442695, %v700_v17  ;;  %v704_v31 = vmax.f32 %v629_v29, 0.0 }
 0x24f   :  { %v765_v22 = vmul.f32 -1.442695, %v702_v53  ;;  %v705_v33 = vmax.f32 %v631_v30, 0.0 }
 0x250   :  { %1037 = vpow2.f32 %v764_v21  ;;  %v718_v34 = vsub.f32 %v704_v31, %v534_v14 }
 0x251   :  { %1039 = vpow2.f32 %v765_v22  ;;  %v719_v36 = vsub.f32 %v705_v33, %v538_v12 }
 0x25a   :  { %v1038_v23 = vpop.eup %1037 }
 0x25b   :  { %v1040_v25 = vpop.eup %1039  ;;  %v712_v26 = vadd.f32 1.0, %v1038_v23 }
 0x25c   :  { %v713_v28 = vadd.f32 1.0, %v1040_v25 }
 0x25d   :  { %1041 = vrcp.f32 %v712_v26 }
 0x25e   :  { %1043 = vrcp.f32 %v713_v28 }
 0x267   :  { %v1042_v35 = vpop.eup %1041 }
 0x268   :  { %v1044_v37 = vpop.eup %1043  ;;  %v720_v38 = vmul.f32 %v1042_v35, %v718_v34 }
 0x269   :  { %v721_v39 = vmul.f32 %v1044_v37, %v719_v36 }
 0x26b   :  { %v724_v40 = vcombine.low %v720_v38, %v721_v39 }
 0x26d   :  { %v731_v41 = vrot.slane %v724_v40, %v390_v7 }
 0x26f   :  { %v738_v0 = vrot.slane %v731_v41, %v390_v7 }
 0x271   :  { %v740_v45 = vadd.f32 %v738_v0, %v400_v11 }
 0x273   :  { %745 = vst.msk [vmem:[#allocation8] sm:$0x3] %vm743_vm0, %v740_v45 }
 0x274   :  { %1122 = shalt.err (!%p1119_p0)
}
 0x275   :  { %s1123_s10 = scalar_lea.hbm %s1277_s5, 32 }
 0x276   :  { %p1124_p1 = scmp.ne.s32.totalorder %s1277_s5, %s1123_s10  ;;  %p1127_p2 = scmp.lt.u32.totalorder %s1123_s10, %s1277_s5 }
 0x278   :  { %p1129_p3 = pnand %p1127_p2, %p1124_p1 }
 0x27a   :  { %1132 = shalt.err (!%p1129_p3)
}
 0x27b   :  { %755 = dma.vmem_to_hbm [thread:$0]  %s753_s6, 32, %s1277_s5, [#allocation4]  }
 0x27c   :  { %1137 = dma.done.wait [#allocation4], 32  }
 0x27d   :  { %1138 = vsyncadd [#allocation4], 4294967264 }
 0x27e   :  { %759 = vsyncpa [#allocation3], 1 }
 0x27f   :  { %760 = vsyncpa [#allocation6], 1 }
 0x280   :  { %761 = vsyncpa [#allocation4], 1 }

</bundles_post_ra>
